<compile_context>
chip_gen: v5e
topology: v5e:2x2
jax: 0.10.0
libtpu: 0.0.40
codegen_flags: <defaults>
</compile_context>

<pallas_src>
import functools
import math

import jax
import jax.numpy as jnp
from jax.experimental import pallas as pl
from jax.experimental.pallas import tpu as pltpu


def _round_up(x, m):
    return (x + m - 1) // m * m


def _vmem_capacity_bytes():
    """Physical VMEM of the current TPU generation (guarded, conservative fallback)."""
    try:
        info = pltpu.get_tpu_info()
        cap = getattr(info, "vmem_capacity_bytes", None)
        if cap:
            return int(cap)
    except Exception:
        pass
    return 64 * 1024 * 1024  # conservative: v7x physical VMEM


def _gcn_message_kernel(di_ref, a_ref, dh_ref,
                        w1_ref, b1_ref, w2_ref, b2_ref, w3_ref, b3_ref,
                        out_ref, acc_ref, *, bk, dh_resident):
    """Grid = (row tiles of A, contraction tiles of A); axis 1 is the reduction."""
    k = pl.program_id(1)

    @pl.when(k == 0)
    def _init():
        acc_ref[...] = jnp.zeros_like(acc_ref)

    if dh_resident:
        # dH lives fully in VMEM (constant index_map); slice this k-chunk.
        start = pl.multiple_of(k * bk, bk)
        dh = dh_ref[pl.ds(start, bk), :]
    else:
        dh = dh_ref[...]  # streamed per k-tile (huge-graph fallback)

    # A_tile @ (d * H)_tile on the MXU, f32 accumulation.
    acc_ref[...] += jnp.dot(a_ref[...], dh, preferred_element_type=jnp.float32)

    @pl.when(k == pl.num_programs(1) - 1)
    def _finalize():
        # Output-side degree scaling, then the 3-layer MLP (bias + ReLU epilogue),
        # fused into the last contraction step of this row tile.
        x = di_ref[...] * acc_ref[...]                                  # [bm, Fp] f32
        h1 = jnp.dot(x, w1_ref[...], preferred_element_type=jnp.float32) + b1_ref[...]
        h1 = jnp.maximum(h1, 0.0)                                       # Dropout = identity (eval)
        h2 = jnp.dot(h1, w2_ref[...], preferred_element_type=jnp.float32) + b2_ref[...]
        h2 = jnp.maximum(h2, 0.0)
        out = jnp.dot(h2, w3_ref[...], preferred_element_type=jnp.float32) + b3_ref[...]
        out_ref[...] = out.astype(out_ref.dtype)


def message_gcn_forward(node_features, adjacency_matrix, degree_matrix, params,
                        *, block_m=512, block_k=512, a_dtype=jnp.bfloat16):
    """Pallas implementation of MessageGCN.forward.

    Args:
      node_features:    [N, F]
      adjacency_matrix: [N, N]  (0/1 GCN adjacency; bf16 default cast is exact)
      degree_matrix:    [N, N]  DIAGONAL degree-normalization matrix D^{-1/2}.
                        Only its diagonal is used; off-diagonal entries are ignored.
      params: dict with w1[F,Hd], b1[1,Hd], w2[Hd,Hd], b2[1,Hd], w3[Hd,O], b3[1,O]
              (weights stored [in, out], i.e. transposed from PyTorch's [out, in])
      a_dtype: dtype for the adjacency / dH streams (bf16 default; f32 for
               non-binary adjacencies or strict-precision checks).

    Returns (message [N, O], adjacency_matrix, degree_matrix), mirroring the module.
    """
    N, F = node_features.shape
    Hd = params["w1"].shape[1]
    O = params["w3"].shape[1]

    # D is diagonal by construction -> keep only diag(D) as an [N, 1] column.
    deg = jnp.diagonal(degree_matrix).astype(jnp.float32)[:, None]

    # Lane-dense padding (multiples of 128) for feature / hidden / output dims.
    Fp = _round_up(F, 128)
    Hdp = _round_up(Hd, 128)
    Op = _round_up(O, 128)

    # ---- tile selection -------------------------------------------------------
    # Contraction dim (A columns / dH rows): multiple of 128 (lane dim of the A
    # tile); bk is forced to divide the lane-padded N so there is no lcm blow-up.
    Nc = _round_up(N, 128)
    bk = max(128, min(_round_up(block_k, 128), Nc))
    while Nc % bk:
        bk -= 128
    # Row dim (A rows / output rows): multiple of 64 (sublane-aligned).  Keep at
    # least 2 row tiles when the graph allows it so v7x's 2 TensorCores both get
    # work on the "parallel" axis (shrink bm rather than leaving one TC idle).
    N_rows = _round_up(N, 64)
    bm = max(64, min(_round_up(block_m, 64), N_rows))
    if N_rows // bm < 2 and N_rows > 64:
        bm = _round_up((N_rows + 1) // 2, 64)
    Nr = _round_up(N, bm)

    # ---- VMEM budget (generation-aware) --------------------------------------
    a_itemsize = jnp.dtype(a_dtype).itemsize
    cap = int(0.85 * _vmem_capacity_bytes())           # ~54 MiB v7x, ~109 MiB v5e/v6e
    # Keep dH fully resident when it comfortably fits; otherwise stream per k-tile
    # (for very large graphs prefer raising block_m instead).
    dh_resident = (2 * Nc * Fp * a_itemsize) <= cap // 4

    wb_bytes = 4 * (Fp * Hdp + Hdp * Hdp + Hdp * Op + 2 * Hdp + Op)
    dh_vmem = 2 * (Nc if dh_resident else bk) * Fp * a_itemsize
    est_vmem = (2 * bm * bk * a_itemsize                # A tiles (double-buffered)
                + dh_vmem                               # dH
                + 2 * bm * Op * 4                       # output tile
                + 2 * bm * 4                            # diag(D) rows
                + 2 * wb_bytes                          # resident MLP weights/biases
                + bm * Fp * 4)                          # f32 accumulator
    vmem_limit = int(min(cap, max(2 * est_vmem, 32 * 1024 * 1024)))

    # ---- pad & cast operands ---------------------------------------------------
    a_pad = jnp.pad(adjacency_matrix.astype(a_dtype), ((0, Nr - N), (0, Nc - N)))
    dh = deg * node_features.astype(jnp.float32)        # d * H, computed once
    dh_pad = jnp.pad(dh, ((0, Nc - N), (0, Fp - F))).astype(a_dtype)
    di_pad = jnp.pad(deg, ((0, Nr - N), (0, 0)))        # output-side diag(D)

    w1 = jnp.pad(params["w1"].astype(jnp.float32), ((0, Fp - F), (0, Hdp - Hd)))
    b1 = jnp.pad(params["b1"].astype(jnp.float32), ((0, 0), (0, Hdp - Hd)))
    w2 = jnp.pad(params["w2"].astype(jnp.float32), ((0, Hdp - Hd), (0, Hdp - Hd)))
    b2 = jnp.pad(params["b2"].astype(jnp.float32), ((0, 0), (0, Hdp - Hd)))
    w3 = jnp.pad(params["w3"].astype(jnp.float32), ((0, Hdp - Hd), (0, Op - O)))
    b3 = jnp.pad(params["b3"].astype(jnp.float32), ((0, 0), (0, Op - O)))

    grid = (Nr // bm, Nc // bk)

    resident = lambda i, k: (0, 0)   # constant index_map: DMAed once, stays in VMEM
    dh_spec = (pl.BlockSpec((Nc, Fp), resident) if dh_resident
               else pl.BlockSpec((bk, Fp), lambda i, k: (k, 0)))
    in_specs = [
        pl.BlockSpec((bm, 1), lambda i, k: (i, 0)),    # diag(D) rows of this output tile
        pl.BlockSpec((bm, bk), lambda i, k: (i, k)),   # A tile (bf16: 0/1 exact)
        dh_spec,                                       # dH = diag(D) @ H (pre-scaled)
        pl.BlockSpec((Fp, Hdp), resident),             # w1
        pl.BlockSpec((1, Hdp), resident),              # b1
        pl.BlockSpec((Hdp, Hdp), resident),            # w2
        pl.BlockSpec((1, Hdp), resident),              # b2
        pl.BlockSpec((Hdp, Op), resident),             # w3
        pl.BlockSpec((1, Op), resident),               # b3
    ]
    out_spec = pl.BlockSpec((bm, Op), lambda i, k: (i, 0))

    # Honest cost estimate (resident dH -> H fetched once from HBM).
    flops = (2 * Nr * Nc * Fp + Nr * Fp
             + 2 * Nr * (Fp * Hdp + Hdp * Hdp + Hdp * Op))
    dh_hbm = (1 if dh_resident else Nr // bm) * Nc * Fp * a_itemsize
    bytes_accessed = (Nr * Nc * a_itemsize + dh_hbm
                      + 4 * Nr + wb_bytes + 4 * Nr * Op)

    kernel = functools.partial(_gcn_message_kernel, bk=bk, dh_resident=dh_resident)

    out_pad = pl.pallas_call(
        kernel,
        out_shape=jax.ShapeDtypeStruct((Nr, Op), jnp.float32),
        grid_spec=pltpu.PrefetchScalarGridSpec(
            num_scalar_prefetch=0,
            grid=grid,
            in_specs=in_specs,
            out_specs=out_spec,
            scratch_shapes=[pltpu.VMEM((bm, Fp), jnp.float32)],
        ),
        compiler_params=pltpu.CompilerParams(
            dimension_semantics=("parallel", "arbitrary"),
            vmem_limit_bytes=vmem_limit,
        ),
        cost_estimate=pl.CostEstimate(flops=flops, transcendentals=0,
                                      bytes_accessed=bytes_accessed),
    )(di_pad, a_pad, dh_pad, w1, b1, w2, b2, w3, b3)

    message = out_pad[:N, :O]
    return message, adjacency_matrix, degree_matrix


def init_params(key, n_node_features, hidden_units, output_units):
    """Deterministic PyTorch-style (Kaiming-uniform-ish) init; weights stored [in, out]."""
    def linear(key, fan_in, fan_out):
        kw, kb = jax.random.split(key)
        bound = 1.0 / jnp.sqrt(jnp.float32(fan_in))
        w = jax.random.uniform(kw, (fan_in, fan_out), jnp.float32, -bound, bound)
        b = jax.random.uniform(kb, (1, fan_out), jnp.float32, -bound, bound)
        return w, b

    k1, k2, k3 = jax.random.split(key, 3)
    w1, b1 = linear(k1, n_node_features, hidden_units)
    w2, b2 = linear(k2, hidden_units, hidden_units)
    w3, b3 = linear(k3, hidden_units, output_units)
    return {"w1": w1, "b1": b1, "w2": w2, "b2": b2, "w3": w3, "b3": b3}


def _reference_forward(node_features, adjacency_matrix, degree_matrix, params):
    with jax.default_matmul_precision("highest"):
        x = degree_matrix @ adjacency_matrix @ degree_matrix @ node_features
        h1 = jnp.maximum(x @ params["w1"] + params["b1"], 0.0)
        h2 = jnp.maximum(h1 @ params["w2"] + params["b2"], 0.0)
        return h2 @ params["w3"] + params["b3"]


if __name__ == "__main__":
    # Small, deterministic example: 300 nodes, 8 node features, 32 hidden units, 1 output unit.
    # Tile selection picks bm=192 (2 row tiles -> both v7x TCs busy), bk=384 (divides the
    # lane-padded N=384, single contraction step), i.e. only 384 padded rows (not 512).
    N = 300
    F = 8
    HIDDEN = 32
    OUT = 1

    key = jax.random.PRNGKey(0)
    k_feat, k_adj, k_params = jax.random.split(key, 3)

    node_features = jax.random.normal(k_feat, (N, F), jnp.float32)

    # Symmetric 0/1 adjacency with self loops.
    a_rand = jax.random.uniform(k_adj, (N, N), jnp.float32)
    adjacency = (a_rand + a_rand.T > 1.0).astype(jnp.float32)
    adjacency = jnp.maximum(adjacency, jnp.eye(N, dtype=jnp.float32))

    # Degree matrix D^{-1/2} (symmetric normalization as in Kipf & Welling).
    deg = jnp.sum(adjacency, axis=1)
    degree = jnp.diag(1.0 / jnp.sqrt(deg))

    params = init_params(k_params, F, HIDDEN, OUT)

    ref = _reference_forward(node_features, adjacency, degree, params)

    # Default (performance) path: bf16 adjacency (exact for 0/1) + bf16 dH.
    # The only rounding is on dH, hence the dtype-aware (looser) tolerance.
    message, adj_out, deg_out = message_gcn_forward(
        node_features, adjacency, degree, params)
    jax.block_until_ready((message, adj_out, deg_out))
    assert message.shape == (N, OUT)
    assert adj_out is adjacency and deg_out is degree
    assert jnp.allclose(message, ref, atol=2e-2, rtol=2e-2)

    # Strict f32 path: tight check against the full-precision reference.
    message32, _, _ = message_gcn_forward(
        node_features, adjacency, degree, params, a_dtype=jnp.float32)
    jax.block_until_ready(message32)
    assert jnp.allclose(message32, ref, atol=1e-3, rtol=1e-3)

    print("KERNEL_OK")
</pallas_src>

<mosaic_0001>
module attributes {stable_mosaic.version = 11 : i64} {
  func.func @_gcn_message_kernel(%arg0: i32, %arg1: i32, %arg2: memref<192x1xf32, #tpu.memory_space<vmem>>, %arg3: memref<192x384xbf16, #tpu.memory_space<vmem>>, %arg4: memref<384x128xbf16, #tpu.memory_space<vmem>>, %arg5: memref<128x128xf32, #tpu.memory_space<vmem>>, %arg6: memref<1x128xf32, #tpu.memory_space<vmem>>, %arg7: memref<128x128xf32, #tpu.memory_space<vmem>>, %arg8: memref<1x128xf32, #tpu.memory_space<vmem>>, %arg9: memref<128x128xf32, #tpu.memory_space<vmem>>, %arg10: memref<1x128xf32, #tpu.memory_space<vmem>>, %arg11: memref<192x128xf32, #tpu.memory_space<vmem>>, %arg12: memref<192x128xf32, #tpu.memory_space<vmem>>) attributes {dimension_semantics = [#tpu.dimension_semantics<parallel>, #tpu.dimension_semantics<arbitrary>], iteration_bounds = array<i64: 2, 1>, scalar_prefetch = 0 : i64, scratch_operands = 1 : i64, tpu.core_type = #tpu.core_type<tc>, window_params = [{transform_indices = @transform_0, window_bounds = array<i64: 192, 1>}, {transform_indices = @transform_1, window_bounds = array<i64: 192, 384>}, {pipeline_mode = #tpu.pipeline_mode<synchronous>, transform_indices = @transform_2, window_bounds = array<i64: 384, 128>}, {pipeline_mode = #tpu.pipeline_mode<synchronous>, transform_indices = @transform_3, window_bounds = array<i64: 128, 128>}, {pipeline_mode = #tpu.pipeline_mode<synchronous>, transform_indices = @transform_4, window_bounds = array<i64: 1, 128>}, {pipeline_mode = #tpu.pipeline_mode<synchronous>, transform_indices = @transform_5, window_bounds = array<i64: 128, 128>}, {pipeline_mode = #tpu.pipeline_mode<synchronous>, transform_indices = @transform_6, window_bounds = array<i64: 1, 128>}, {pipeline_mode = #tpu.pipeline_mode<synchronous>, transform_indices = @transform_7, window_bounds = array<i64: 128, 128>}, {pipeline_mode = #tpu.pipeline_mode<synchronous>, transform_indices = @transform_8, window_bounds = array<i64: 1, 128>}, {transform_indices = @transform_9, window_bounds = array<i64: 192, 128>}]} {
    %c0_i32 = arith.constant 0 : i32
    %0 = arith.cmpi eq, %arg1, %c0_i32 : i32
    %1 = arith.extui %0 : i1 to i32
    %c0_i32_0 = arith.constant 0 : i32
    %2 = arith.cmpi ne, %1, %c0_i32_0 : i32
    scf.if %2 {
      %cst_9 = arith.constant 0.000000e+00 : f32
      %15 = vector.broadcast %cst_9 : f32 to vector<192x128xf32>
      %c0_10 = arith.constant 0 : index
      %c0_11 = arith.constant 0 : index
      %16 = vector.load %arg12[%c0_10, %c0_11] : memref<192x128xf32, #tpu.memory_space<vmem>>, vector<192x128xf32>
      tpu.vector_store %arg12[%c0_10, %c0_11], %15 {strides = array<i32>} : memref<192x128xf32, #tpu.memory_space<vmem>>, vector<192x128xf32>,
    } else {
    }
    %c384_i32 = arith.constant 384 : i32
    %3 = arith.muli %arg1, %c384_i32 : i32
    %4 = tpu.assume_multiple %3, 384 : i32
    %5 = arith.index_cast %4 : i32 to index
    %c0 = arith.constant 0 : index
    %6 = vector.load %arg4[%5, %c0] : memref<384x128xbf16, #tpu.memory_space<vmem>>, vector<384x128xbf16>
    %c0_1 = arith.constant 0 : index
    %c0_2 = arith.constant 0 : index
    %7 = vector.load %arg12[%c0_1, %c0_2] : memref<192x128xf32, #tpu.memory_space<vmem>>, vector<192x128xf32>
    %c0_3 = arith.constant 0 : index
    %c0_4 = arith.constant 0 : index
    %8 = vector.load %arg3[%c0_3, %c0_4] : memref<192x384xbf16, #tpu.memory_space<vmem>>, vector<192x384xbf16>
    %cst = arith.constant dense<0.000000e+00> : vector<192x128xf32>
    %9 = tpu.matmul %8, %6, %cst {dimension_numbers = #tpu.dot_dimension_numbers<[1], [0], [0], [1], [0, 0, 1, 1], [], []>} : vector<192x384xbf16>, vector<384x128xbf16>, vector<192x128xf32> -> vector<192x128xf32>
    %10 = arith.addf %7, %9 : vector<192x128xf32>
    %c0_5 = arith.constant 0 : index
    %c0_6 = arith.constant 0 : index
    %11 = vector.load %arg12[%c0_5, %c0_6] : memref<192x128xf32, #tpu.memory_space<vmem>>, vector<192x128xf32>
    tpu.vector_store %arg12[%c0_5, %c0_6], %10 {strides = array<i32>} : memref<192x128xf32, #tpu.memory_space<vmem>>, vector<192x128xf32>,
    %c0_i32_7 = arith.constant 0 : i32
    %12 = arith.cmpi eq, %arg1, %c0_i32_7 : i32
    %13 = arith.extui %12 : i1 to i32
    %c0_i32_8 = arith.constant 0 : i32
    %14 = arith.cmpi ne, %13, %c0_i32_8 : i32
    scf.if %14 {
      %c0_9 = arith.constant 0 : index
      %c0_10 = arith.constant 0 : index
      %15 = vector.load %arg2[%c0_9, %c0_10] : memref<192x1xf32, #tpu.memory_space<vmem>>, vector<192x1xf32>
      %c0_11 = arith.constant 0 : index
      %c0_12 = arith.constant 0 : index
      %16 = vector.load %arg12[%c0_11, %c0_12] : memref<192x128xf32, #tpu.memory_space<vmem>>, vector<192x128xf32>
      %17 = vector.broadcast %15 : vector<192x1xf32> to vector<192x128xf32>
      %18 = arith.mulf %17, %16 : vector<192x128xf32>
      %c0_13 = arith.constant 0 : index
      %c0_14 = arith.constant 0 : index
      %19 = vector.load %arg5[%c0_13, %c0_14] : memref<128x128xf32, #tpu.memory_space<vmem>>, vector<128x128xf32>
      %cst_15 = arith.constant dense<0.000000e+00> : vector<192x128xf32>
      %20 = tpu.matmul %18, %19, %cst_15 {dimension_numbers = #tpu.dot_dimension_numbers<[1], [0], [0], [1], [0, 0, 1, 1], [], []>} : vector<192x128xf32>, vector<128x128xf32>, vector<192x128xf32> -> vector<192x128xf32>
      %c0_16 = arith.constant 0 : index
      %c0_17 = arith.constant 0 : index
      %21 = vector.load %arg6[%c0_16, %c0_17] : memref<1x128xf32, #tpu.memory_space<vmem>>, vector<1x128xf32>
      %22 = vector.broadcast %21 : vector<1x128xf32> to vector<192x128xf32>
      %23 = arith.addf %20, %22 : vector<192x128xf32>
      %cst_18 = arith.constant 0.000000e+00 : f32
      %24 = vector.broadcast %cst_18 : f32 to vector<192x128xf32>
      %25 = arith.maximumf %23, %24 : vector<192x128xf32>
      %c0_19 = arith.constant 0 : index
      %c0_20 = arith.constant 0 : index
      %26 = vector.load %arg7[%c0_19, %c0_20] : memref<128x128xf32, #tpu.memory_space<vmem>>, vector<128x128xf32>
      %cst_21 = arith.constant dense<0.000000e+00> : vector<192x128xf32>
      %27 = tpu.matmul %25, %26, %cst_21 {dimension_numbers = #tpu.dot_dimension_numbers<[1], [0], [0], [1], [0, 0, 1, 1], [], []>} : vector<192x128xf32>, vector<128x128xf32>, vector<192x128xf32> -> vector<192x128xf32>
      %c0_22 = arith.constant 0 : index
      %c0_23 = arith.constant 0 : index
      %28 = vector.load %arg8[%c0_22, %c0_23] : memref<1x128xf32, #tpu.memory_space<vmem>>, vector<1x128xf32>
      %29 = vector.broadcast %28 : vector<1x128xf32> to vector<192x128xf32>
      %30 = arith.addf %27, %29 : vector<192x128xf32>
      %cst_24 = arith.constant 0.000000e+00 : f32
      %31 = vector.broadcast %cst_24 : f32 to vector<192x128xf32>
      %32 = arith.maximumf %30, %31 : vector<192x128xf32>
      %c0_25 = arith.constant 0 : index
      %c0_26 = arith.constant 0 : index
      %33 = vector.load %arg9[%c0_25, %c0_26] : memref<128x128xf32, #tpu.memory_space<vmem>>, vector<128x128xf32>
      %cst_27 = arith.constant dense<0.000000e+00> : vector<192x128xf32>
      %34 = tpu.matmul %32, %33, %cst_27 {dimension_numbers = #tpu.dot_dimension_numbers<[1], [0], [0], [1], [0, 0, 1, 1], [], []>} : vector<192x128xf32>, vector<128x128xf32>, vector<192x128xf32> -> vector<192x128xf32>
      %c0_28 = arith.constant 0 : index
      %c0_29 = arith.constant 0 : index
      %35 = vector.load %arg10[%c0_28, %c0_29] : memref<1x128xf32, #tpu.memory_space<vmem>>, vector<1x128xf32>
      %36 = vector.broadcast %35 : vector<1x128xf32> to vector<192x128xf32>
      %37 = arith.addf %34, %36 : vector<192x128xf32>
      %c0_30 = arith.constant 0 : index
      %c0_31 = arith.constant 0 : index
      %38 = vector.load %arg11[%c0_30, %c0_31] : memref<192x128xf32, #tpu.memory_space<vmem>>, vector<192x128xf32>
      tpu.vector_store %arg11[%c0_30, %c0_31], %37 {strides = array<i32>} : memref<192x128xf32, #tpu.memory_space<vmem>>, vector<192x128xf32>,
    } else {
    }
    return
  }
  func.func @transform_0(%arg0: i32, %arg1: i32) -> (i32, i32) {
    %c0_i32 = arith.constant 0 : i32
    %c0_i32_0 = arith.constant 0 : i32
    return %arg0, %c0_i32 : i32, i32
  }
  func.func @transform_1(%arg0: i32, %arg1: i32) -> (i32, i32) {
    %c0_i32 = arith.constant 0 : i32
    return %arg0, %arg1 : i32, i32
  }
  func.func @transform_2(%arg0: i32, %arg1: i32) -> (i32, i32) {
    %c0_i32 = arith.constant 0 : i32
    %c0_i32_0 = arith.constant 0 : i32
    %c0_i32_1 = arith.constant 0 : i32
    return %c0_i32, %c0_i32_0 : i32, i32
  }
  func.func @transform_3(%arg0: i32, %arg1: i32) -> (i32, i32) {
    %c0_i32 = arith.constant 0 : i32
    %c0_i32_0 = arith.constant 0 : i32
    %c0_i32_1 = arith.constant 0 : i32
    return %c0_i32, %c0_i32_0 : i32, i32
  }
  func.func @transform_4(%arg0: i32, %arg1: i32) -> (i32, i32) {
    %c0_i32 = arith.constant 0 : i32
    %c0_i32_0 = arith.constant 0 : i32
    %c0_i32_1 = arith.constant 0 : i32
    return %c0_i32, %c0_i32_0 : i32, i32
  }
  func.func @transform_5(%arg0: i32, %arg1: i32) -> (i32, i32) {
    %c0_i32 = arith.constant 0 : i32
    %c0_i32_0 = arith.constant 0 : i32
    %c0_i32_1 = arith.constant 0 : i32
    return %c0_i32, %c0_i32_0 : i32, i32
  }
  func.func @transform_6(%arg0: i32, %arg1: i32) -> (i32, i32) {
    %c0_i32 = arith.constant 0 : i32
    %c0_i32_0 = arith.constant 0 : i32
    %c0_i32_1 = arith.constant 0 : i32
    return %c0_i32, %c0_i32_0 : i32, i32
  }
  func.func @transform_7(%arg0: i32, %arg1: i32) -> (i32, i32) {
    %c0_i32 = arith.constant 0 : i32
    %c0_i32_0 = arith.constant 0 : i32
    %c0_i32_1 = arith.constant 0 : i32
    return %c0_i32, %c0_i32_0 : i32, i32
  }
  func.func @transform_8(%arg0: i32, %arg1: i32) -> (i32, i32) {
    %c0_i32 = arith.constant 0 : i32
    %c0_i32_0 = arith.constant 0 : i32
    %c0_i32_1 = arith.constant 0 : i32
    return %c0_i32, %c0_i32_0 : i32, i32
  }
  func.func @transform_9(%arg0: i32, %arg1: i32) -> (i32, i32) {
    %c0_i32 = arith.constant 0 : i32
    %c0_i32_0 = arith.constant 0 : i32
    return %arg0, %c0_i32 : i32, i32
  }
}

</mosaic_0001>

<bundles_post_ra>
// kernel: tpu_custom_call.1
= control target key start
LH: loop header
LB: loop body
LE: loop exit
PB: predicated region body
PF: predicated region fallthrough
CT: control target
= control target key end

     0   :  { %s3125_s0 = inlined_call_operand.vmem [shape: f32[384,1], index: 0, kind: input, shape index: {}]   ;;  %s3126_s1 = inlined_call_operand.hbm [shape: bf16[384,384], index: 1, kind: input, shape index: {}]   ;;  %s3127_s2 = inlined_call_operand.vmem [shape: bf16[384,128], index: 2, kind: input, shape index: {}]   ;;  %s3128_s3 = inlined_call_operand.vmem [shape: f32[128,128], index: 3, kind: input, shape index: {}]   ;;  %s3129_s4 = inlined_call_operand.vmem [shape: f32[1,128], index: 4, kind: input, shape index: {}]   ;;  %s3130_s5 = inlined_call_operand.hbm [shape: f32[128,128], index: 5, kind: input, shape index: {}]   ;;  %s3131_s6 = inlined_call_operand.vmem [shape: f32[1,128], index: 6, kind: input, shape index: {}]   ;;  %s3132_s7 = inlined_call_operand.hbm [shape: f32[128,128], index: 7, kind: input, shape index: {}]   ;;  %s3133_s8 = inlined_call_operand.vmem [shape: f32[1,128], index: 8, kind: input, shape index: {}]   ;;  %s3134_s9 = inlined_call_operand.hbm [shape: f32[384,128], index: 9, kind: output, shape index: {}]  }
   0x1   :  { %3140 = sst [smem:[#allocation16_spill]] %s3130_s5 }
   0x2   :  { %3141 = sst [smem:[#allocation17_spill]] %s3132_s7 }
   0x3   :  { %3142 = sst [smem:[#allocation18_spill]] %s3134_s9 }
   0x4   :  { %14 = vsyncpa [#allocation4], 0 }
   0x5   :  { %16 = vsyncpa [#allocation4 + $0x1], 0 }
   0x6   :  { %17 = vsyncpa [#allocation7], 0 }
   0x7   :  { %18 = vsyncpa [#allocation5], 0 }
   0x8   :  { %20 = vsyncpa [#allocation5 + $0x1], 0  ;;  %s2568_s30 = smov 0   ;;  %s2570_s10 = smov 0  }
   0x9   :  { %s2572_s11 = smov 0   ;;  %s2574_s12 = smov 0  }
   0xa   :  { %s2576_s13 = smov 0   ;;  %s2578_s14 = smov 0  }
   0xb LB: > { %3143 = sst [smem:[#allocation13_spill]] %s2487_s30  ;;  %s1899_s15 = sadd.s32 4294967295, %s2507_s14   ;;  %s2507_s14 = sphi %s2578_s14, %s26_s14   ;;  %s2503_s13 = sphi %s2576_s13, %s3162_s13   ;;  %s2499_s12 = sphi %s2574_s12, %s3161_s12   ;;  %s2495_s11 = sphi %s2572_s11, %s3160_s11   ;;  %s2491_s10 = sphi %s2570_s10, %s3159_s10   ;;  %s2487_s30 = sphi %s2568_s30, %s3158_s30  }
   0xc   : > { %3144 = sst [smem:[#allocation14_spill]] %s2507_s14  ;;  %s1900_s16 = sadd.s32 4294967294, %s2507_s14  }
   0xd   : > { %p86_p0 = scmp.ne.s32.totalorder %s2491_s10, %s2487_s30  ;;  %p2602_p1 = scmp.eq.s32.totalorder %s1899_s15, 0 }
   0xe   : > { %p2606_p2 = scmp.eq.s32.totalorder %s1899_s15, 1  ;;  %p263_p3 = scmp.eq.s32.totalorder %s1900_s16, 1 }
   0xf   : > { %p2612_p4 = por %p2602_p1, %p86_p0  ;;  %p1901_p5 = scmp.ge.s32.totalorder %s2507_s14, 1 }
  0x10   : > { %p2617_p6 = por %p263_p3, %p86_p0  ;;  %p270_p7 = scmp.lt.s32.totalorder %s2507_s14, 3 }
  0x11   : > { %s3150_s5 = sld [smem:[#allocation16_spill]]  ;;  %s2509_s25 = smov [#allocation6]  }
  0x12   : > { %s3148_s20 = scalar_select %p2617_p6, 1, 0 }
  0x13   : > { %p2625_p8 = pnand %p1901_p5, %p270_p7  ;;  %s292_s26 = sshll.u32 %s2509_s25, 4  ;;  %s293_s26 = int_to_ptr.vmem [resolvable:$true] %s292_s26 }
  0x14   : > { %3149 = sst [smem:[#allocation15_spill]] %s3148_s20  ;;  %p1904_p11 = scmp.ge.s32.totalorder %s2507_s14, 2 }
  0x15   : > { %p2246_p9 = pneg %p2625_p8  ;;  %s3152_s7 = sld [smem:[#allocation17_spill]] }
  0x16   : > { %s2510_s15 = smov 128   ;;  %s2511_s16 = smov 8  }
  0x17   : > { %s290_s23 = sshll.u32 %s3150_s5, 4  ;;  %p2247_p10 = pnand %p2246_p9, %p2602_p1  ;;  %s291_s23 = int_to_ptr.hbm [resolvable:$true] %s290_s23 }
  0x18   : > { %s2512_s21 = smov [#allocation8]   ;;  %s38_s25 = sadd.s32 1, %s2503_s13 }
  0x19   : > { %2249 = dma.hbm_to_vmem [thread:$0]  (!%p2247_p10), %s291_s23, 2048, %s293_s26, [#allocation7], %s2510_s15, %s2510_s15, %s2511_s16  }
  0x1a   : > { %s309_s22 = sshll.u32 %s2512_s21, 4  ;;  %s73_s5 = sadd.s32 1, %s2495_s11  ;;  %s310_s22 = int_to_ptr.vmem [resolvable:$true] %s309_s22 }
  0x1b   : > { %s307_s29 = sshll.u32 %s3152_s7, 4  ;;  %p40_p12 = scmp.ge.s32.totalorder %s38_s25, 2  ;;  %s308_s29 = int_to_ptr.hbm [resolvable:$true] %s307_s29 }
  0x1c   : > { %2252 = dma.hbm_to_vmem [thread:$0]  (!%p2247_p10), %s308_s29, 2048, %s310_s22, [#allocation7], %s2510_s15, %s2510_s15, %s2511_s16  }
  0x1d   : > { %p80_p13 = scmp.ne.s32.totalorder %s2495_s11, %s2491_s10  ;;  %p81_p0 = scmp.eq.s32.totalorder %s2507_s14, 0 }
  0x1e   : > { %p2263_p3 = scmp.lt.s32.totalorder %s2507_s14, 2  ;;  %s3164_s25 = smov (%p40_p12, %s38_s25), 0 }
  0x1f   : > { %p82_p5 = por %p81_p0, %p80_p13  ;;  %p2647_p7 = por %p2606_p2, %p80_p13 }
  0x20   : > { %s68_s23 = ssub.s32 %s2503_s13, %s3164_s25  ;;  %s335_s26 = sand.u32 1, %s2495_s11  }
  0x21   : > { %p71_p9 = scmp.eq.s32.totalorder %s68_s23, 0  ;;  %s2230_s28 = smul.u32 288, %s335_s26 }
  0x22   : > { %p2254_p10 = pnand %p2263_p3, %p82_p5  ;;  %s2264_s15 = smul.u32 288, %s2503_s13 }
  0x23   : > { %s2655_s29 = scalar_select %p71_p9, %s2495_s11, %s73_s5  }
  0x24   : > { %s339_s16 = scalar_lea.vmem [#allocation3], %s2230_s28  ;;  %s347_s14 = scalar_lea.hbm %s3126_s1, %s2264_s15 }
  0x25   : > { %s350_s21 = sshll.u32 %s339_s16, 4  ;;  %s348_s18 = sshll.u32 %s347_s14, 4  ;;  %s351_s21 = int_to_ptr.vmem [resolvable:$true] %s350_s21  ;;  %s349_s18 = int_to_ptr.hbm [resolvable:$true] %s348_s18 }
  0x26   : > { %s336_s20 = scalar_lea.sflag [#allocation4], %s335_s26  ;;  %s2513_s30 = smov 192  }
  0x27   : > { %s2514_s9 = smov 12   ;;  %362 = sbr.rel (%p2625_p8) target bundleno = 894 (0x37e), region = 56 }
  0x28   : > { %2256 = dma.hbm_to_vmem [thread:$0]  (!%p2254_p10), %s349_s18, 4608, %s351_s21, %s336_s20, %s2513_s30, %s2513_s30, %s2514_s9  }
  0x29   : > { %s2664_s5 = sand.u32 (!%p2625_p8), 1, %s2491_s10  }
  0x2a   : > { %s2232_s23 = smul.u32 (!%p2625_p8), 288, %s2664_s5  ;;  %s365_s28 = scalar_lea.sflag (!%p2625_p8), [#allocation4], %s2664_s5 }
  0x2c   : > { %s2668_s16 = scalar_lea.vmem [#allocation3], %s2232_s23 }
  0x2d   : > { %2474 = dma.done.wait (%p2612_p4), %s365_s28, 4608  }
  0x2e   : > { %2476 = vsyncadd (%p2612_p4), %s365_s28, 4294962688 }
  0x2f   : > { %2478 = dma.done.wait (%p2602_p1), [#allocation7], 4096  }
  0x30   : > { %2480 = vsyncadd (%p2602_p1), [#allocation7], 4294963200  ;;  %v2160_v0 = vld [vmem:[%s3127_s2 + $0x38] sm:$0xff]  ;;  %v2159_v2 = vld [vmem:[%s3127_s2 + $0x30] sm:$0xff]  ;;  %s419_s19 = smul.u32 24, %s2499_s12  ;;  %v2515_v34 = vmov 0  }
  0x31   : > { %v2168_v1 = vld [vmem:[%s3127_s2 + $0x78] sm:$0xff]  ;;  %2214 = vmatpush.bf16.msra.mxu2 %v2160_v0  ;;  %v2167_v3 = vld [vmem:[%s3127_s2 + $0x70] sm:$0xff]  ;;  %917 = vmatpush.bf16.msra.mxu0 %v2160_v0  ;;  %v2158_v4 = vld [vmem:[%s3127_s2 + $0x28] sm:$0xff]  ;;  %s2233_s23 = smul.u32 192, %s2664_s5  ;;  %s1767_s15 = scalar_lea.sflag [#allocation5], %s2664_s5 }
  0x32   : > { %2222 = vmatpush.bf16.msra.mxu3 %v2168_v1  ;;  %986 = vmatpush.bf16.msra.mxu1 %v2168_v1  ;;  %v2166_v5 = vld [vmem:[%s3127_s2 + $0x68] sm:$0xff]  ;;  %v2157_v6 = vld [vmem:[%s3127_s2 + $0x20] sm:$0xff]  ;;  %v2156_v8 = vld [vmem:[%s3127_s2 + $0x18] sm:$0xff]  ;;  %p420_p1 = scmp.lt.s32.totalorder %s419_s19, 47  ;;  %s2213_s14 = smul.u32 192, %s2499_s12 }
  0x33   : > { %v2165_v7 = vld [vmem:[%s3127_s2 + $0x60] sm:$0xff]  ;;  %v2164_v9 = vld [vmem:[%s3127_s2 + $0x58] sm:$0xff]  ;;  %v2155_v10 = vld [vmem:[%s3127_s2 + $0x10] sm:$0xff]  ;;  %2325 = vset.pattern.permute.xlu0 %v2515_v34  ;;  %2326 = vset.pattern.permute.xlu1 %v2515_v34  ;;  %s3030_s30 = scalar_lea.vmem [#allocation9], %s2233_s23 }
  0x34   : > { %v2163_v11 = vld [vmem:[%s3127_s2 + $0x50] sm:$0xff]  ;;  %v2154_v12 = vld [vmem:[%s3127_s2 + $0x8] sm:$0xff]  ;;  %v2153_v14 = vld [vmem:[%s3127_s2] sm:$0xff]  ;;  %s3166_s19 = smov (!%p420_p1, %s419_s19), 47  ;;  %2327 = vset.pattern.permute.xlu2 %v2515_v34 }
  0x35   : > { %2215 = vmatpush.bf16.msra.mxu2 %v2159_v2  ;;  %918 = vmatpush.bf16.msra.mxu0 %v2159_v2  ;;  %v2162_v13 = vld [vmem:[%s3127_s2 + $0x48] sm:$0xff]  ;;  %v2161_v15 = vld [vmem:[%s3127_s2 + $0x40] sm:$0xff]  ;;  %v1984_v16 = vld [vmem:[%s2668_s16 + $0x90] sm:$0xf]  ;;  %s1909_s22 = sshll.u32 %s3166_s19, 3  ;;  %s3154_s19 = sld [smem:[#allocation18_spill]] }
  0x36   : > { %2223 = vmatpush.bf16.msra.mxu3 %v2167_v3  ;;  %987 = vmatpush.bf16.msra.mxu1 %v2167_v3  ;;  %v2196_v17 = vld [vmem:[%s2668_s16 + $0x98] sm:$0xf0]  ;;  %v2195_v18 = vld [vmem:[%s2668_s16 + $0x94] sm:$0xf]  ;;  %v1986_v19 = vld [vmem:[%s2668_s16 + $0x9c] sm:$0xf0]  ;;  %s2750_s28 = scalar_lea.vmem %s3125_s0, %s1909_s22 }
  0x37   : > { %v2176_v20 = vld [vmem:[%s3127_s2 + $0xb8] sm:$0xff]  ;;  %v1985_v21 = vor.u32 %v2196_v17, %v1984_v16  ;;  %v1989_v22 = vor.u32 %v2195_v18, %v1986_v19  ;;  %v2175_v23 = vld [vmem:[%s3127_s2 + $0xb0] sm:$0xff]  ;;  %v2174_v24 = vld [vmem:[%s3127_s2 + $0xa8] sm:$0xff] }
  0x38   : > { %v2173_v25 = vld [vmem:[%s3127_s2 + $0xa0] sm:$0xff]  ;;  %v1996_v26 = vld [vmem:[%s2668_s16 + $0xa8] sm:$0xf]  ;;  %v2199_v27 = vld [vmem:[%s2668_s16 + $0xb0] sm:$0xf0] }
  0x39   : > { %2216 = vmatpush.bf16.msra.mxu2 %v2158_v4  ;;  %919 = vmatpush.bf16.msra.mxu0 %v2158_v4  ;;  %v2198_v28 = vld [vmem:[%s2668_s16 + $0xac] sm:$0xf]  ;;  %v1998_v29 = vld [vmem:[%s2668_s16 + $0xb4] sm:$0xf0]  ;;  %v1997_v30 = vor.u32 %v2199_v27, %v1996_v26  ;;  %v1175_v33 = vld [vmem:[%s2750_s28] sm:$0xff] }
  0x3a   : > { %2224 = vmatpush.bf16.msra.mxu3 %v2166_v5  ;;  %988 = vmatpush.bf16.msra.mxu1 %v2166_v5  ;;  %v2001_v31 = vor.u32 %v2198_v28, %v1998_v29  ;;  %v2172_v32 = vld [vmem:[%s3127_s2 + $0x98] sm:$0xff]  ;;  %v2171_v35 = vld [vmem:[%s3127_s2 + $0x90] sm:$0xff]  ;;  %v2008_v36 = vld [vmem:[%s2668_s16 + $0xc0] sm:$0xf] }
  0x3b   : > { %1225 = vperm.xlu0 %2325, %v1175_v33   ;;  %v2202_v37 = vld [vmem:[%s2668_s16 + $0xc8] sm:$0xf0]  ;;  %v2201_v38 = vld [vmem:[%s2668_s16 + $0xc4] sm:$0xf]  ;;  %v2010_v39 = vld [vmem:[%s2668_s16 + $0xcc] sm:$0xf0]  ;;  %s1778_s26 = scalar_lea.hbm %s3154_s19, %s2213_s14 }
  0x3c   : > { %v2009_v40 = vor.u32 %v2202_v37, %v2008_v36  ;;  %v2013_v41 = vor.u32 %v2201_v38, %v2010_v39  ;;  %v1176_v42 = vld [vmem:[%s2750_s28 + $0x8] sm:$0xff]  ;;  %v1177_v44 = vld [vmem:[%s2750_s28 + $0x10] sm:$0xff]  ;;  %v2020_v46 = vld [vmem:[%s2668_s16 + $0xd8] sm:$0xf]  ;;  %s1781_s17 = sshll.u32 %s1778_s26, 4  ;;  %s2441_s18 = scalar_lea.hbm %s3154_s19, 384  ;;  %s1782_s17 = int_to_ptr.hbm [resolvable:$true] %s1781_s17 }
  0x3d   : > { %2217 = vmatpush.bf16.msra.mxu2 %v2157_v6  ;;  %920 = vmatpush.bf16.msra.mxu0 %v2157_v6  ;;  %v2170_v43 = vld [vmem:[%s3127_s2 + $0x88] sm:$0xff]  ;;  %v1181_v45 = vld [vmem:[%s2750_s28 + $0x30] sm:$0xff]  ;;  %v2205_v47 = vld [vmem:[%s2668_s16 + $0xe0] sm:$0xf0] }
  0x3e   : > { %2225 = vmatpush.bf16.msra.mxu3 %v2165_v7  ;;  %989 = vmatpush.bf16.msra.mxu1 %v2165_v7  ;;  %v2204_v48 = vld [vmem:[%s2668_s16 + $0xdc] sm:$0xf]  ;;  %v2022_v49 = vld [vmem:[%s2668_s16 + $0xe4] sm:$0xf0]  ;;  %v2021_v50 = vor.u32 %v2205_v47, %v2020_v46  ;;  %v2169_v54 = vld [vmem:[%s3127_s2 + $0x80] sm:$0xff] }
  0x3f   : > { %1235 = vperm.xlu1 %2326, %v1177_v44   ;;  %v2025_v51 = vor.u32 %v2204_v48, %v2022_v49  ;;  %v1178_v52 = vld [vmem:[%s2750_s28 + $0x18] sm:$0xff]  ;;  %v1184_v53 = vld [vmem:[%s2750_s28 + $0x48] sm:$0xff]  ;;  %v1912_v55 = vld [vmem:[%s2668_s16] sm:$0xf] }
  0x40   : > { %v2178_v56 = vld [vmem:[%s2668_s16 + $0x8] sm:$0xf0]  ;;  %v2177_v57 = vld [vmem:[%s2668_s16 + $0x4] sm:$0xf]  ;;  %v1914_v58 = vld [vmem:[%s2668_s16 + $0xc] sm:$0xf0] }
  0x41   : > { %2218 = vmatpush.bf16.msra.mxu2 %v2156_v8  ;;  %921 = vmatpush.bf16.msra.mxu0 %v2156_v8  ;;  %v1913_v59 = vor.u32 %v2178_v56, %v1912_v55  ;;  %v1917_v60 = vor.u32 %v2177_v57, %v1914_v58  ;;  %v1182_v61 = vld [vmem:[%s2750_s28 + $0x38] sm:$0xff]  ;;  %v1187_v62 = vld [vmem:[%s2750_s28 + $0x60] sm:$0xff]  ;;  %v2032_v63 = vld [vmem:[%s2668_s16 + $0xf0] sm:$0xf] }
  0x42   : > { %2226 = vmatpush.bf16.msra.mxu3 %v2164_v9  ;;  %990 = vmatpush.bf16.msra.mxu1 %v2164_v9  ;;  %v2208_v0 = vld [vmem:[%s2668_s16 + $0xf8] sm:$0xf0]  ;;  %v2207_v1 = vld [vmem:[%s2668_s16 + $0xf4] sm:$0xf]  ;;  %v2034_v2 = vld [vmem:[%s2668_s16 + $0xfc] sm:$0xf0] }
  0x43   : > { %1230 = vperm.xlu0 %2325, %v1176_v42   ;;  %v2033_v3 = vor.u32 %v2208_v0, %v2032_v63  ;;  %v2037_v4 = vor.u32 %v2207_v1, %v2034_v2  ;;  %v1185_v5 = vld [vmem:[%s2750_s28 + $0x50] sm:$0xff]  ;;  %v1190_v6 = vld [vmem:[%s2750_s28 + $0x78] sm:$0xff]  ;;  %v2181_v8 = vld [vmem:[%s2668_s16 + $0x20] sm:$0xf0] }
  0x44   : > { %v1924_v7 = vld [vmem:[%s2668_s16 + $0x18] sm:$0xf]  ;;  %v2211_v16 = vld [vmem:[%s2668_s16 + $0x110] sm:$0xf0]  ;;  %v2210_v17 = vld [vmem:[%s2668_s16 + $0x10c] sm:$0xf] }
  0x45   : > { %2219 = vmatpush.bf16.msra.mxu2 %v2155_v10  ;;  %922 = vmatpush.bf16.msra.mxu0 %v2155_v10  ;;  %v1925_v9 = vor.u32 %v2181_v8, %v1924_v7  ;;  %v2180_v10 = vld [vmem:[%s2668_s16 + $0x1c] sm:$0xf]  ;;  %v2046_v18 = vld [vmem:[%s2668_s16 + $0x114] sm:$0xf0]  ;;  %v2183_v26 = vld [vmem:[%s2668_s16 + $0x34] sm:$0xf] }
  0x46   : > { %2227 = vmatpush.bf16.msra.mxu3 %v2163_v11  ;;  %991 = vmatpush.bf16.msra.mxu1 %v2163_v11  ;;  %v1926_v11 = vld [vmem:[%s2668_s16 + $0x24] sm:$0xf0]  ;;  %v1938_v27 = vld [vmem:[%s2668_s16 + $0x3c] sm:$0xf0]  ;;  %v2179_v33 = vld [vmem:[%s2668_s16 + $0x10] sm:$0xf0] }
  0x47   : > { %1240 = vperm.xlu1 %2326, %v1178_v52   ;;  %v1941_v29 = vor.u32 %v2183_v26, %v1938_v27  ;;  %v1197_v36 = vld [vmem:[%s2750_s28 + $0xb0] sm:$0xff]  ;;  %v1382_v37 = vld [vmem:[%s3128_s3 + $0x78] sm:$0xff]  ;;  %v1932_v39 = vld [vmem:[%s2668_s16 + $0x20] sm:$0xf] }
  0x48   : > { %v1186_v38 = vld [vmem:[%s2750_s28 + $0x58] sm:$0xff]  ;;  %v2187_v42 = vld [vmem:[%s2668_s16 + $0x50] sm:$0xf0]  ;;  %v1192_v52 = vld [vmem:[%s2750_s28 + $0x88] sm:$0xff] }
  0x49   : > { %2220 = vmatpush.bf16.msra.mxu2 %v2154_v12  ;;  %923 = vmatpush.bf16.msra.mxu0 %v2154_v12  ;;  %v1929_v12 = vor.u32 %v2180_v10, %v1926_v11  ;;  %v1381_v48 = vld [vmem:[%s3128_s3 + $0x70] sm:$0xff]  ;;  %v1960_v55 = vld [vmem:[%s2668_s16 + $0x60] sm:$0xf]  ;;  %v2190_v56 = vld [vmem:[%s2668_s16 + $0x68] sm:$0xf0] }
  0x4a   : > { %2228 = vmatpush.bf16.msra.mxu3 %v2162_v13  ;;  %992 = vmatpush.bf16.msra.mxu1 %v2162_v13  ;;  %v1188_v13 = vld [vmem:[%s2750_s28 + $0x68] sm:$0xff]  ;;  %v1189_v49 = vld [vmem:[%s2750_s28 + $0x70] sm:$0xff]  ;;  %v2189_v57 = vld [vmem:[%s2668_s16 + $0x64] sm:$0xf]  ;;  %v1961_v58 = vor.u32 %v2190_v56, %v1960_v55 }
  0x4b   : > { %1255 = vperm.xlu0 %2325, %v1181_v45   ;;  %v1950_v45 = vld [vmem:[%s2668_s16 + $0x54] sm:$0xf0]  ;;  %v1195_v63 = vld [vmem:[%s2750_s28 + $0xa0] sm:$0xff]  ;;  %v1377_v1 = vld [vmem:[%s3128_s3 + $0x50] sm:$0xff] }
  0x4c   : > { %v1198_v2 = vld [vmem:[%s2750_s28 + $0xb8] sm:$0xff]  ;;  %v2194_v26 = vld [vmem:[%s2668_s16 + $0x88] sm:$0xf0] }
  0x4d   : > { %2221 = vmatpush.bf16.msra.mxu2 %v2153_v14  ;;  %924 = vmatpush.bf16.msra.mxu0 %v2153_v14  ;;  %v1193_v14 = vld [vmem:[%s2750_s28 + $0x90] sm:$0xff]  ;;  %v2192_v7 = vld [vmem:[%s2668_s16 + $0x7c] sm:$0xf] }
  0x4e   : > { %2229 = vmatpush.bf16.msra.mxu3 %v2161_v15  ;;  %993 = vmatpush.bf16.msra.mxu1 %v2161_v15  ;;  %v2044_v15 = vld [vmem:[%s2668_s16 + $0x108] sm:$0xf] }
  0x4f   : > { %1260 = vperm.xlu1 %2326, %v1182_v61   ;;  %v2045_v19 = vor.u32 %v2211_v16, %v2044_v15  ;;  %v1374_v16 = vld [vmem:[%s3128_s3 + $0x38] sm:$0xff] }
  0x50   : > { %955 = vmatmul.bf16.vlgmr.msra.gmra.mxu2 %v1985_v21  ;;  %925 = vmatmul.bf16.vlgmr.msra.gmra.mxu0 %v1913_v59  ;;  %v1179_v21 = vld [vmem:[%s2750_s28 + $0x20] sm:$0xff]  ;;  %v1962_v59 = vld [vmem:[%s2668_s16 + $0x6c] sm:$0xf0] }
  0x51   : > { %1055 = vmatpush.bf16.msrb.mxu2 %v2176_v20  ;;  %1024 = vmatmul.bf16.vlgmr.msra.gmra.mxu3 %v1989_v22  ;;  %v2049_v20 = vor.u32 %v2210_v17, %v2046_v18  ;;  %v1191_v22 = vld [vmem:[%s2750_s28 + $0x80] sm:$0xff]  ;;  %v1968_v17 = vld [vmem:[%s2668_s16 + $0x68] sm:$0xf]  ;;  %v2191_v18 = vld [vmem:[%s2668_s16 + $0x70] sm:$0xf0] }
  0x52   : > { %994 = vmatmul.bf16.vlgmr.msra.gmra.mxu1 %v1917_v60  ;;  %1245 = vperm.xlu2 %2327, %v1179_v21   ;;  %v1965_v60 = vor.u32 %v2189_v57, %v1962_v59  ;;  %v1373_v21 = vld [vmem:[%s3128_s3 + $0x30] sm:$0xff] }
  0x53   : > { %1270 = vperm.xlu0 %2325, %v1184_v53   ;;  %1387 = vmatpush.msrb.mxu3 %v1382_v37  ;;  %v1944_v53 = vld [vmem:[%s2668_s16 + $0x38] sm:$0xf]  ;;  %v1367_v37 = vld [vmem:[%s3128_s3] sm:$0xff] }
  0x55   : > { %1056 = vmatpush.bf16.msrb.mxu2 %v2175_v23  ;;  %v1196_v23 = vld [vmem:[%s2750_s28 + $0xa8] sm:$0xff]  ;;  %1388 = vmatpush.msrb.mxu3 %v1381_v48 }
  0x56   : > { %v2016_v48 = vld [vmem:[%s2668_s16 + $0xc8] sm:$0xf] }
  0x57   : > { %1275 = vperm.xlu1 %2326, %v1185_v5   ;;  %v1972_v5 = vld [vmem:[%s2668_s16 + $0x78] sm:$0xf] }
  0x59   : > { %1057 = vmatpush.bf16.msrb.mxu2 %v2174_v24  ;;  %v1936_v24 = vld [vmem:[%s2668_s16 + $0x30] sm:$0xf] }
  0x5b   : > { %1285 = vperm.xlu0 %2325, %v1187_v62   ;;  %v1378_v62 = vld [vmem:[%s3128_s3 + $0x58] sm:$0xff] }
  0x5d   : > { %1058 = vmatpush.bf16.msrb.mxu2 %v2173_v25  ;;  %v2184_v25 = vld [vmem:[%s2668_s16 + $0x38] sm:$0xf0] }
  0x5e   : > { %v1937_v28 = vor.u32 %v2184_v25, %v1936_v24  ;;  %v1371_v24 = vld [vmem:[%s3128_s3 + $0x20] sm:$0xff] }
  0x5f   : > { %1290 = vperm.xlu1 %2326, %v1188_v13   ;;  %v1376_v13 = vld [vmem:[%s3128_s3 + $0x48] sm:$0xff]  ;;  %v1980_v25 = vld [vmem:[%s2668_s16 + $0x80] sm:$0xf] }
  0x60   : > { %960 = vmatmul.bf16.gmra.mxu2 %v1997_v30  ;;  %930 = vmatmul.bf16.gmra.mxu0 %v1925_v9  ;;  %v1180_v30 = vld [vmem:[%s2750_s28 + $0x28] sm:$0xff] }
  0x61   : > { %1029 = vmatmul.bf16.gmra.mxu3 %v2001_v31  ;;  %1059 = vmatpush.bf16.msrb.mxu2 %v2172_v32  ;;  %v1194_v31 = vld [vmem:[%s2750_s28 + $0x98] sm:$0xff]  ;;  %v1920_v32 = vld [vmem:[%s2668_s16 + $0x8] sm:$0xf] }
  0x62   : > { %999 = vmatmul.bf16.gmra.mxu1 %v1929_v12  ;;  %1250 = vperm.xlu2 %2327, %v1180_v30   ;;  %v1921_v34 = vor.u32 %v2179_v33, %v1920_v32  ;;  %v1974_v9 = vld [vmem:[%s2668_s16 + $0x84] sm:$0xf0]  ;;  %v1992_v32 = vld [vmem:[%s2668_s16 + $0x98] sm:$0xf]  ;;  %v2197_v33 = vld [vmem:[%s2668_s16 + $0xa0] sm:$0xf0] }
  0x63   : > { %1300 = vperm.xlu0 %2325, %v1190_v6   ;;  %v2193_v6 = vld [vmem:[%s2668_s16 + $0x80] sm:$0xf0]  ;;  %v1977_v11 = vor.u32 %v2192_v7, %v1974_v9 }
  0x64   : > { %v1973_v8 = vor.u32 %v2193_v6, %v1972_v5 }
  0x65   : > { %1060 = vmatpush.bf16.msrb.mxu2 %v2171_v35  ;;  %v1183_v35 = vld [vmem:[%s2750_s28 + $0x40] sm:$0xff]  ;;  %s1779_s28 = sshll.u32 %s3030_s30, 4  ;;  %s1780_s28 = int_to_ptr.vmem [resolvable:$true] %s1779_s28 }
  0x67   : > { %1305 = vperm.xlu1 %2326, %v1191_v22  }
  0x69   : > { %1061 = vmatpush.bf16.msrb.mxu2 %v2170_v43  ;;  %v2186_v43 = vld [vmem:[%s2668_s16 + $0x4c] sm:$0xf] }
  0x6a   : > { %1265 = vperm.xlu2 %2327, %v1183_v35   ;;  %v1953_v46 = vor.u32 %v2186_v43, %v1950_v45  ;;  %v1993_v35 = vor.u32 %v2197_v33, %v1992_v32 }
  0x6b   : > { %1315 = vperm.xlu0 %2325, %v1193_v14   ;;  %v1375_v14 = vld [vmem:[%s3128_s3 + $0x40] sm:$0xff] }
  0x6d   : > { %1062 = vmatpush.bf16.msrb.mxu2 %v2169_v54  ;;  %v2185_v54 = vld [vmem:[%s2668_s16 + $0x40] sm:$0xf0] }
  0x6e   : > { %v1945_v61 = vor.u32 %v2185_v54, %v1944_v53 }
  0x6f   : > { %1320 = vperm.xlu1 %2326, %v1194_v31   ;;  %v1369_v31 = vld [vmem:[%s3128_s3 + $0x10] sm:$0xff] }
  0x70   : > { %965 = vmatmul.bf16.gmra.mxu2 %v2009_v40  ;;  %935 = vmatmul.bf16.gmra.mxu0 %v1937_v28  ;;  %v2182_v40 = vld [vmem:[%s2668_s16 + $0x28] sm:$0xf0]  ;;  %v1981_v28 = vor.u32 %v2194_v26, %v1980_v25 }
  0x71   : > { %1034 = vmatmul.bf16.gmra.mxu3 %v2013_v41  ;;  %v1948_v41 = vld [vmem:[%s2668_s16 + $0x48] sm:$0xf]  ;;  %v1933_v47 = vor.u32 %v2182_v40, %v1932_v39  ;;  %v2004_v40 = vld [vmem:[%s2668_s16 + $0xb0] sm:$0xf] }
  0x72   : > { %1004 = vmatmul.bf16.gmra.mxu1 %v1941_v29  ;;  %1280 = vperm.xlu2 %2327, %v1186_v38   ;;  %v1949_v44 = vor.u32 %v2187_v42, %v1948_v41  ;;  %v1370_v29 = vld [vmem:[%s3128_s3 + $0x18] sm:$0xff] }
  0x73   : > { %1330 = vperm.xlu0 %2325, %v1196_v23   ;;  %v1372_v23 = vld [vmem:[%s3128_s3 + $0x28] sm:$0xff]  ;;  %v2200_v41 = vld [vmem:[%s2668_s16 + $0xb8] sm:$0xf0] }
  0x77   : > { %1335 = vperm.xlu1 %2326, %v1197_v36   ;;  %v1368_v36 = vld [vmem:[%s3128_s3 + $0x8] sm:$0xff] }
  0x7a   : > { %1295 = vperm.xlu2 %2327, %v1189_v49   ;;  %v2203_v49 = vld [vmem:[%s2668_s16 + $0xd0] sm:$0xf0] }
  0x80   : > { %970 = vmatmul.bf16.gmra.mxu2 %v2021_v50  ;;  %940 = vmatmul.bf16.gmra.mxu0 %v1949_v44  ;;  %v1380_v50 = vld [vmem:[%s3128_s3 + $0x68] sm:$0xff]  ;;  %v2005_v44 = vor.u32 %v2200_v41, %v2004_v40 }
  0x81   : > { %1039 = vmatmul.bf16.gmra.mxu3 %v2025_v51  ;;  %v1379_v51 = vld [vmem:[%s3128_s3 + $0x60] sm:$0xff] }
  0x82   : > { %1009 = vmatmul.bf16.gmra.mxu1 %v1953_v46  ;;  %1389 = vmatpush.msrb.mxu3 %v1380_v50 }
  0x83   : > { %1310 = vperm.xlu2 %2327, %v1192_v52  }
  0x84   : > { %1390 = vmatpush.msrb.mxu3 %v1379_v51  ;;  %v2017_v51 = vor.u32 %v2203_v49, %v2016_v48  ;;  %v2052_v48 = vld [vmem:[%s2668_s16 + $0x110] sm:$0xf]  ;;  %v2212_v49 = vld [vmem:[%s2668_s16 + $0x118] sm:$0xf0] }
  0x86   : > { %1391 = vmatpush.msrb.mxu3 %v1378_v62  ;;  %v2206_v62 = vld [vmem:[%s2668_s16 + $0xe8] sm:$0xf0] }
  0x88   : > { %1392 = vmatpush.msrb.mxu3 %v1377_v1 }
  0x8a   : > { %1393 = vmatpush.msrb.mxu3 %v1376_v13 }
  0x8b   : > { %1325 = vperm.xlu2 %2327, %v1195_v63  }
  0x8c   : > { %1394 = vmatpush.msrb.mxu3 %v1375_v14  ;;  %v1514_v14 = vld [vmem:[#allocation6 + $0x70] sm:$0xff] }
  0x8e   : > { %1395 = vmatpush.msrb.mxu3 %v1374_v16 }
  0x90   : > { %975 = vmatmul.bf16.gmra.mxu2 %v2033_v3  ;;  %945 = vmatmul.bf16.gmra.mxu0 %v1961_v58  ;;  %v1956_v3 = vld [vmem:[%s2668_s16 + $0x50] sm:$0xf] }
  0x91   : > { %1044 = vmatmul.bf16.gmra.mxu3 %v2037_v4  ;;  %v2188_v4 = vld [vmem:[%s2668_s16 + $0x58] sm:$0xf0] }
  0x92   : > { %1014 = vmatmul.bf16.gmra.mxu1 %v1965_v60  ;;  %v1957_v12 = vor.u32 %v2188_v4, %v1956_v3  ;;  %1396 = vmatpush.msrb.mxu3 %v1373_v21 }
  0x93   : > { %1340 = vperm.xlu2 %2327, %v1198_v2  }
  0x94   : > { %1397 = vmatpush.msrb.mxu3 %v1372_v23 }
  0x96   : > { %1398 = vmatpush.msrb.mxu3 %v1371_v24 }
  0x98   : > { %1399 = vmatpush.msrb.mxu3 %v1370_v29  ;;  %v1513_v29 = vld [vmem:[#allocation6 + $0x68] sm:$0xff] }
  0x9a   : > { %1400 = vmatpush.msrb.mxu3 %v1369_v31 }
  0x9c   : > { %1401 = vmatpush.msrb.mxu3 %v1368_v36  ;;  %v1512_v36 = vld [vmem:[#allocation6 + $0x60] sm:$0xff] }
  0x9e   : > { %1402 = vmatpush.msrb.mxu3 %v1367_v37 }
  0xa0   : > { %980 = vmatmul.bf16.gmra.mxu2 %v2045_v19  ;;  %950 = vmatmul.bf16.gmra.mxu0 %v1973_v8  ;;  %v1515_v8 = vld [vmem:[#allocation6 + $0x78] sm:$0xff] }
  0xa1   : > { %1049 = vmatmul.bf16.gmra.mxu3 %v2049_v20  ;;  %v1969_v20 = vor.u32 %v2191_v18, %v1968_v17  ;;  %1520 = vmatpush.msrb.mxu0 %v1515_v8  ;;  %v2040_v18 = vld [vmem:[%s2668_s16 + $0xf8] sm:$0xf] }
  0xa2   : > { %1019 = vmatmul.bf16.gmra.mxu1 %v1977_v11 }
  0xa3   : > { %1521 = vmatpush.msrb.mxu0 %v1514_v14 }
  0xa5   : > { %1522 = vmatpush.msrb.mxu0 %v1513_v29 }
  0xa7   : > { %1523 = vmatpush.msrb.mxu0 %v1512_v36 }
  0xac   : > { %v1246_v37 = vpop.permute.xlu2 %1245 }
  0xad   : > { %v1226_v55 = vpop.permute.xlu0 %1225 }
  0xb0   : > { %1063 = vmatmul.bf16.vlgmr.msrb.gmra.mxu2 %v1921_v34 }
  0xb1   : > { %v1236_v11 = vpop.permute.xlu1 %1235 }
  0xb5   : > { %v1231_v4 = vpop.permute.xlu0 %1230 }
  0xb9   : > { %v1241_v31 = vpop.permute.xlu1 %1240 }
  0xc0   : > { %1068 = vmatmul.bf16.gmra.mxu2 %v1933_v47 }
  0xcd   : > { %v926_v39 = vpop.f32.mrf.mxu0 }
  0xcf   : > { %v995_v42 = vpop.f32.mrf.mxu1 }
  0xd0   : > { %1073 = vmatmul.bf16.gmra.mxu2 %v1945_v61  ;;  %v996_v54 = vadd.f32 %v995_v42, %v926_v39  ;;  %v2028_v61 = vld [vmem:[%s2668_s16 + $0xe0] sm:$0xf] }
  0xd1   : > { %v2029_v3 = vor.u32 %v2206_v62, %v2028_v61 }
  0xd3   : > { %v2844_v0 = vpop.f32.mrf.mxu2 }
  0xd4   : > { %v2920_v16 = vpop.f32.mrf.mxu3 }
  0xd5   : > { %v928_v45 = vpop.f32.mrf.mxu0 }
  0xd7   : > { %v997_v47 = vpop.f32.mrf.mxu1 }
  0xd8   : > { %v998_v63 = vadd.f32 %v997_v47, %v928_v45  ;;  %v1511_v45 = vld [vmem:[#allocation6 + $0x58] sm:$0xff] }
  0xd9   : > { %1524 = vmatpush.msrb.mxu0 %v1511_v45 }
  0xdb   : > { %v2856_v10 = vpop.f32.mrf.mxu2 }
  0xdc   : > { %v2924_v33 = vpop.f32.mrf.mxu3 }
  0xdd   : > { %v931_v52 = vpop.f32.mrf.mxu0 }
  0xdf   : > { %v1000_v53 = vpop.f32.mrf.mxu1 }
  0xe0   : > { %1078 = vmatmul.bf16.gmra.mxu2 %v1957_v12  ;;  %v1001_v6 = vadd.f32 %v1000_v53, %v931_v52 }
  0xe3   : > { %v2864_v15 = vpop.f32.mrf.mxu2 }
  0xe4   : > { %v2926_v47 = vpop.f32.mrf.mxu3 }
  0xe5   : > { %v933_v59 = vpop.f32.mrf.mxu0 }
  0xe7   : > { %v1002_v60 = vpop.f32.mrf.mxu1 }
  0xe8   : > { %v1003_v21 = vadd.f32 %v1002_v60, %v933_v59 }
  0xeb   : > { %v2871_v19 = vpop.f32.mrf.mxu2 }
  0xec   : > { %v2930_v61 = vpop.f32.mrf.mxu3 }
  0xed   : > { %v936_v7 = vpop.f32.mrf.mxu0 }
  0xef   : > { %v1005_v9 = vpop.f32.mrf.mxu1 }
  0xf0   : > { %1083 = vmatmul.bf16.gmra.mxu2 %v1969_v20  ;;  %v2209_v20 = vld [vmem:[%s2668_s16 + $0x100] sm:$0xf0]  ;;  %s2435_s16 = sshra.s32 %s1782_s17, 4  ;;  %s2436_s16 = int_to_ptr.hbm [resolvable:$true] %s2435_s16 }
  0xf1   : > { %s2437_s12 = scalar_lea.hbm %s2436_s16, 192  ;;  %p2442_p12 = scmp.lt.s32.totalorder %s2436_s16, %s3154_s19 }
  0xf2   : > { %p2438_p2 = scmp.ne.s32.totalorder %s2436_s16, %s2437_s12  ;;  %p2443_p13 = scmp.lt.s32.totalorder %s2441_s18, %s2437_s12 }
  0xf3   : > { %v2876_v22 = vpop.f32.mrf.mxu2 }
  0xf4   : > { %p2439_p4 = pnand %p2438_p2, %p2647_p7  ;;  %p2444_p0 = por %p2443_p13, %p2442_p12 }
  0xf5   : > { %v938_v23 = vpop.f32.mrf.mxu0 }
  0xf6   : > { %p2440_p8 = pneg %p2439_p4 }
  0xf7   : > { %v1007_v25 = vpop.f32.mrf.mxu1 }
  0xf8   : > { %p2445_p3 = pnand %p2444_p0, %p2440_p8 }
  0xfb   : > { %v2886_v27 = vpop.f32.mrf.mxu2 }
  0xfd   : > { %v941_v41 = vpop.f32.mrf.mxu0 }
  0xff   : > { %v1010_v42 = vpop.f32.mrf.mxu1 }
 0x100   : > { %1088 = vmatmul.bf16.gmra.mxu2 %v1981_v28  ;;  %v2041_v28 = vor.u32 %v2209_v20, %v2040_v18  ;;  %v1011_v60 = vadd.f32 %v1010_v42, %v941_v41  ;;  %v1504_v42 = vld [vmem:[#allocation6 + $0x20] sm:$0xff] }
 0x103   : > { %v2891_v30 = vpop.f32.mrf.mxu2 }
 0x107   : > { %v1012_v59 = vpop.f32.mrf.mxu1 }
 0x10b   : > { %v2898_v34 = vpop.f32.mrf.mxu2 }
 0x110   : > { %1093 = vmatmul.bf16.gmra.mxu2 %v1993_v35  ;;  %v1006_v35 = vadd.f32 %v1005_v9, %v936_v7 }
 0x113   : > { %v2906_v38 = vpop.f32.mrf.mxu2 }
 0x11b   : > { %v2910_v43 = vpop.f32.mrf.mxu2 }
 0x120   : > { %1098 = vmatmul.bf16.gmra.mxu2 %v2005_v44 }
 0x123   : > { %v2912_v46 = vpop.f32.mrf.mxu2 }
 0x12b   : > { %v2916_v50 = vpop.f32.mrf.mxu2 }
 0x130   : > { %1103 = vmatmul.bf16.gmra.mxu2 %v2017_v51  ;;  %v1008_v51 = vadd.f32 %v1007_v25, %v938_v23 }
 0x133   : > { %v1064_v56 = vpop.f32.mrf.mxu2 }
 0x134   : > { %v1065_v57 = vadd.f32 %v1064_v56, %v996_v54  ;;  %v2053_v54 = vor.u32 %v2212_v49, %v2052_v48  ;;  %v1251_v56 = vpop.permute.xlu2 %1250 }
 0x136   : > { %v1343_v58 = vmul.f32 %v1226_v55, %v1065_v57  ;;  %v1510_v55 = vld [vmem:[#allocation6 + $0x50] sm:$0xff] }
 0x137   : > { %1525 = vmatpush.msrb.mxu0 %v1510_v55 }
 0x138   : > { %1403 = vmatmul.f32.vlgmr.msrb.gmra.mxu3 %v1343_v58  ;;  %v943_v58 = vpop.f32.mrf.mxu0 }
 0x139   : > { %v1013_v7 = vadd.f32 %v1012_v59, %v943_v58 }
 0x13b   : > { %v1066_v1 = vpop.f32.mrf.mxu2 }
 0x13c   : > { %v1067_v2 = vadd.f32 %v1066_v1, %v998_v63  ;;  %v1509_v1 = vld [vmem:[#allocation6 + $0x48] sm:$0xff] }
 0x13d   : > { %1526 = vmatpush.msrb.mxu0 %v1509_v1 }
 0x13e   : > { %v1344_v5 = vmul.f32 %v1231_v4, %v1067_v2  ;;  %v1256_v2 = vpop.permute.xlu0 %1255 }
 0x140   : > { %1108 = vmatmul.bf16.gmra.mxu2 %v2029_v3  ;;  %1406 = vmatmul.f32.gmra.mxu3 %v1344_v5  ;;  %v946_v4 = vpop.f32.mrf.mxu0  ;;  %v1508_v5 = vld [vmem:[#allocation6 + $0x40] sm:$0xff] }
 0x141   : > { %1527 = vmatpush.msrb.mxu0 %v1508_v5 }
 0x143   : > { %v1069_v12 = vpop.f32.mrf.mxu2 }
 0x144   : > { %v1070_v13 = vadd.f32 %v1069_v12, %v1001_v6  ;;  %v1015_v6 = vpop.f32.mrf.mxu1  ;;  %v1261_v12 = vpop.permute.xlu1 %1260 }
 0x145   : > { %v1016_v14 = vadd.f32 %v1015_v6, %v946_v4  ;;  %v1501_v6 = vld [vmem:[#allocation6 + $0x8] sm:$0xff] }
 0x146   : > { %v1345_v17 = vmul.f32 %v1236_v11, %v1070_v13  ;;  %v2932_v11 = vpop.f32.mrf.mxu3 }
 0x148   : > { %1409 = vmatmul.f32.gmra.mxu3 %v1345_v17  ;;  %v1507_v17 = vld [vmem:[#allocation6 + $0x38] sm:$0xff]  ;;  %v948_v18 = vpop.f32.mrf.mxu0 }
 0x149   : > { %1528 = vmatpush.msrb.mxu0 %v1507_v17 }
 0x14b   : > { %v1071_v24 = vpop.f32.mrf.mxu2 }
 0x14c   : > { %v1072_v26 = vadd.f32 %v1071_v24, %v1003_v21  ;;  %v1017_v20 = vpop.f32.mrf.mxu1  ;;  %v1266_v24 = vpop.permute.xlu2 %1265 }
 0x14d   : > { %v1018_v29 = vadd.f32 %v1017_v20, %v948_v18  ;;  %v1276_v49 = vpop.permute.xlu1 %1275 }
 0x14e   : > { %v1346_v32 = vmul.f32 %v1241_v31, %v1072_v26  ;;  %v1506_v26 = vld [vmem:[#allocation6 + $0x30] sm:$0xff] }
 0x14f   : > { %1529 = vmatpush.msrb.mxu0 %v1506_v26 }
 0x150   : > { %1113 = vmatmul.bf16.gmra.mxu2 %v2041_v28  ;;  %1412 = vmatmul.f32.gmra.mxu3 %v1346_v32  ;;  %v2934_v28 = vpop.f32.mrf.mxu3  ;;  %v1271_v32 = vpop.permute.xlu0 %1270 }
 0x151   : > { %v951_v36 = vpop.f32.mrf.mxu0 }
 0x153   : > { %v1074_v39 = vpop.f32.mrf.mxu2 }
 0x154   : > { %v1075_v40 = vadd.f32 %v1074_v39, %v1006_v35  ;;  %v1281_v59 = vpop.permute.xlu2 %1280 }
 0x156   : > { %v1347_v44 = vmul.f32 %v1246_v37, %v1075_v40  ;;  %v1020_v37 = vpop.f32.mrf.mxu1  ;;  %v1505_v40 = vld [vmem:[#allocation6 + $0x28] sm:$0xff] }
 0x157   : > { %1530 = vmatpush.msrb.mxu0 %v1505_v40  ;;  %v1021_v41 = vadd.f32 %v1020_v37, %v951_v36  ;;  %v2961_v36 = vld [vmem:[%s3129_s4] ss:$0 sm:$0xff] }
 0x158   : > { %1415 = vmatmul.f32.gmra.mxu3 %v1347_v44  ;;  %v2936_v44 = vpop.f32.mrf.mxu3  ;;  %v1286_v4 = vpop.permute.xlu0 %1285 }
 0x159   : > { %1531 = vmatpush.msrb.mxu0 %v1504_v42  ;;  %v1648_v42 = vld [vmem:[#allocation8 + $0x78] sm:$0xff] }
 0x15a   : > { %1653 = vmatpush.msrb.mxu1 %v1648_v42 }
 0x15b   : > { %v1076_v52 = vpop.f32.mrf.mxu2 }
 0x15c   : > { %v1077_v53 = vadd.f32 %v1076_v52, %v1008_v51  ;;  %v953_v52 = vpop.f32.mrf.mxu0  ;;  %v1296_v20 = vpop.permute.xlu2 %1295 }
 0x15e   : > { %v1348_v57 = vmul.f32 %v1251_v56, %v1077_v53  ;;  %v1022_v53 = vpop.f32.mrf.mxu1 }
 0x15f   : > { %v1023_v55 = vadd.f32 %v1022_v53, %v953_v52 }
 0x160   : > { %1118 = vmatmul.bf16.gmra.mxu2 %v2053_v54  ;;  %1418 = vmatmul.f32.gmra.mxu3 %v1348_v57  ;;  %v1503_v54 = vld [vmem:[#allocation6 + $0x18] sm:$0xff]  ;;  %v2938_v56 = vpop.f32.mrf.mxu3 }
 0x161   : > { %1532 = vmatpush.msrb.mxu0 %v1503_v54  ;;  %v1647_v54 = vld [vmem:[#allocation8 + $0x70] sm:$0xff] }
 0x162   : > { %1654 = vmatpush.msrb.mxu1 %v1647_v54 }
 0x163   : > { %v1079_v62 = vpop.f32.mrf.mxu2 }
 0x164   : > { %v1080_v63 = vadd.f32 %v1079_v62, %v1011_v60  ;;  %v1502_v62 = vld [vmem:[#allocation6 + $0x10] sm:$0xff] }
 0x165   : > { %1533 = vmatpush.msrb.mxu0 %v1502_v62 }
 0x166   : > { %v1349_v3 = vmul.f32 %v1256_v2, %v1080_v63  ;;  %v1026_v63 = vadd.f32 %v2920_v16, %v2844_v0  ;;  %v1031_v0 = vadd.f32 %v2926_v47, %v2864_v15 }
 0x167   : > { %1534 = vmatpush.msrb.mxu0 %v1501_v6 }
 0x168   : > { %1421 = vmatmul.f32.gmra.mxu3 %v1349_v3  ;;  %v2942_v3 = vpop.f32.mrf.mxu3 }
 0x16b   : > { %v1081_v8 = vpop.f32.mrf.mxu2 }
 0x16c   : > { %v1082_v9 = vadd.f32 %v1081_v8, %v1013_v7  ;;  %v1500_v7 = vld [vmem:[#allocation6] sm:$0xff]  ;;  %v1028_v8 = vadd.f32 %v2924_v33, %v2856_v10  ;;  %v1033_v10 = vadd.f32 %v2930_v61, %v2871_v19  ;;  %v1038_v19 = vadd.f32 %v2934_v28, %v2886_v27 }
 0x16d   : > { %1535 = vmatpush.msrb.mxu0 %v1500_v7 }
 0x16e   : > { %v1350_v13 = vmul.f32 %v1261_v12, %v1082_v9 }
 0x170   : > { %1424 = vmatmul.f32.gmra.mxu3 %v1350_v13  ;;  %v1291_v13 = vpop.permute.xlu1 %1290  ;;  %v2946_v17 = vpop.f32.mrf.mxu3 }
 0x173   : > { %v1084_v21 = vpop.f32.mrf.mxu2 }
 0x174   : > { %v1085_v23 = vadd.f32 %v1084_v21, %v1016_v14 }
 0x176   : > { %v1351_v25 = vmul.f32 %v1266_v24, %v1085_v23 }
 0x178   : > { %1427 = vmatmul.f32.gmra.mxu3 %v1351_v25  ;;  %v2950_v23 = vpop.f32.mrf.mxu3  ;;  %v1301_v25 = vpop.permute.xlu0 %1300 }
 0x17b   : > { %v1086_v31 = vpop.f32.mrf.mxu2 }
 0x17c   : > { %v1087_v35 = vadd.f32 %v1086_v31, %v1018_v29  ;;  %v1036_v29 = vadd.f32 %v2932_v11, %v2876_v22  ;;  %v1311_v11 = vpop.permute.xlu2 %1310 }
 0x17e   : > { %v1352_v39 = vmul.f32 %v1271_v32, %v1087_v35  ;;  %v1306_v32 = vpop.permute.xlu1 %1305 }
 0x180   : > { %1430 = vmatmul.f32.gmra.mxu3 %v1352_v39  ;;  %v2956_v31 = vpop.f32.mrf.mxu3  ;;  %v1316_v28 = vpop.permute.xlu0 %1315 }
 0x183   : > { %v1089_v45 = vpop.f32.mrf.mxu2 }
 0x184   : > { %v1090_v48 = vadd.f32 %v1089_v45, %v1021_v41  ;;  %v1041_v45 = vadd.f32 %v2936_v44, %v2891_v30 }
 0x186   : > { %v1353_v51 = vmul.f32 %v1276_v49, %v1090_v48  ;;  %v1321_v44 = vpop.permute.xlu1 %1320 }
 0x188   : > { %1433 = vmatmul.f32.gmra.mxu3 %v1353_v51 }
 0x18b   : > { %v1091_v57 = vpop.f32.mrf.mxu2 }
 0x18c   : > { %v1092_v58 = vadd.f32 %v1091_v57, %v1023_v55  ;;  %v1043_v55 = vadd.f32 %v2938_v56, %v2898_v34  ;;  %v1326_v56 = vpop.permute.xlu2 %1325 }
 0x18e   : > { %v1354_v60 = vmul.f32 %v1281_v59, %v1092_v58 }
 0x190   : > { %1436 = vmatmul.f32.gmra.mxu3 %v1354_v60 }
 0x193   : > { %v1094_v1 = vpop.f32.mrf.mxu2 }
 0x194   : > { %v1095_v2 = vadd.f32 %v1094_v1, %v1026_v63  ;;  %v1646_v63 = vld [vmem:[#allocation8 + $0x68] sm:$0xff]  ;;  %v1046_v1 = vadd.f32 %v2942_v3, %v2906_v38 }
 0x195   : > { %1655 = vmatpush.msrb.mxu1 %v1646_v63  ;;  %v1633_v63 = vld [vmem:[#allocation8] sm:$0xff] }
 0x196   : > { %v1355_v5 = vmul.f32 %v1286_v4, %v1095_v2 }
 0x198   : > { %1439 = vmatmul.f32.gmra.mxu3 %v1355_v5 }
 0x19b   : > { %v1096_v9 = vpop.f32.mrf.mxu2 }
 0x19c   : > { %v1097_v12 = vadd.f32 %v1096_v9, %v1028_v8  ;;  %v1645_v8 = vld [vmem:[#allocation8 + $0x60] sm:$0xff]  ;;  %v1644_v9 = vld [vmem:[#allocation8 + $0x58] sm:$0xff] }
 0x19d   : > { %1656 = vmatpush.msrb.mxu1 %v1645_v8 }
 0x19e   : > { %v1356_v14 = vmul.f32 %v1291_v13, %v1097_v12  ;;  %v1048_v12 = vadd.f32 %v2946_v17, %v2910_v43  ;;  %v1336_v17 = vpop.permute.xlu1 %1335 }
 0x19f   : > { %1657 = vmatpush.msrb.mxu1 %v1644_v9  ;;  %v2996_v9 = vld [vmem:[%s3131_s6] ss:$0 sm:$0xff] }
 0x1a0   : > { %1442 = vmatmul.f32.gmra.mxu3 %v1356_v14 }
 0x1a3   : > { %v1099_v16 = vpop.f32.mrf.mxu2 }
 0x1a4   : > { %v1100_v18 = vadd.f32 %v1099_v16, %v1031_v0  ;;  %v1331_v0 = vpop.permute.xlu0 %1330 }
 0x1a6   : > { %v1357_v21 = vmul.f32 %v1296_v20, %v1100_v18  ;;  %v1643_v20 = vld [vmem:[#allocation8 + $0x50] sm:$0xff] }
 0x1a7   : > { %1658 = vmatpush.msrb.mxu1 %v1643_v20 }
 0x1a8   : > { %1445 = vmatmul.f32.gmra.mxu3 %v1357_v21  ;;  %v1051_v21 = vadd.f32 %v2950_v23, %v2912_v46  ;;  %v1341_v23 = vpop.permute.xlu2 %1340 }
 0x1ab   : > { %v1101_v33 = vpop.f32.mrf.mxu2 }
 0x1ac   : > { %v1102_v24 = vadd.f32 %v1101_v33, %v1033_v10 }
 0x1ae   : > { %v1358_v26 = vmul.f32 %v1301_v25, %v1102_v24 }
 0x1b0   : > { %1448 = vmatmul.f32.gmra.mxu3 %v1358_v26 }
 0x1b3   : > { %v1104_v15 = vpop.f32.mrf.mxu2 }
 0x1b4   : > { %v1105_v47 = vadd.f32 %v1104_v15, %v1036_v29  ;;  %v1642_v29 = vld [vmem:[#allocation8 + $0x48] sm:$0xff]  ;;  %v1053_v15 = vadd.f32 %v2956_v31, %v2916_v50  ;;  %v1639_v50 = vld [vmem:[#allocation8 + $0x30] sm:$0xff] }
 0x1b5   : > { %1659 = vmatpush.msrb.mxu1 %v1642_v29 }
 0x1b6   : > { %v1359_v35 = vmul.f32 %v1306_v32, %v1105_v47 }
 0x1b8   : > { %1451 = vmatmul.f32.gmra.mxu3 %v1359_v35 }
 0x1bb   : > { %v1106_v61 = vpop.f32.mrf.mxu2  ;;  %v1404_v37 = vpop.f32.mrf.mxu3 }
 0x1bc   : > { %v1107_v39 = vadd.f32 %v1106_v61, %v1038_v19  ;;  %v1405_v22 = vadd.f32 %v2961_v36, %v1404_v37  ;;  %v1641_v37 = vld [vmem:[#allocation8 + $0x40] sm:$0xff] }
 0x1bd   : > { %1660 = vmatpush.msrb.mxu1 %v1641_v37 }
 0x1be   : > { %v1360_v40 = vmul.f32 %v1311_v11, %v1107_v39  ;;  %v1476_v41 = vmax.f32 %v1405_v22, 0.0  ;;  %v1640_v39 = vld [vmem:[#allocation8 + $0x38] sm:$0xff] }
 0x1bf   : > { %1661 = vmatpush.msrb.mxu1 %v1640_v39 }
 0x1c0   : > { %1454 = vmatmul.f32.gmra.mxu3 %v1360_v40  ;;  %1536 = vmatmul.f32.vlgmr.msrb.gmra.mxu0 %v1476_v41 }
 0x1c1   : > { %1662 = vmatpush.msrb.mxu1 %v1639_v50 }
 0x1c3   : > { %v1109_v48 = vpop.f32.mrf.mxu2  ;;  %v1407_v49 = vpop.f32.mrf.mxu3 }
 0x1c4   : > { %v1110_v51 = vadd.f32 %v1109_v48, %v1041_v45  ;;  %v1408_v27 = vadd.f32 %v2961_v36, %v1407_v49  ;;  %v1638_v45 = vld [vmem:[#allocation8 + $0x28] sm:$0xff] }
 0x1c5   : > { %1663 = vmatpush.msrb.mxu1 %v1638_v45 }
 0x1c6   : > { %v1361_v52 = vmul.f32 %v1316_v28, %v1110_v51  ;;  %v1477_v53 = vmax.f32 %v1408_v27, 0.0  ;;  %v1637_v27 = vld [vmem:[#allocation8 + $0x20] sm:$0xff]  ;;  %v1636_v28 = vld [vmem:[#allocation8 + $0x18] sm:$0xff] }
 0x1c7   : > { %1664 = vmatpush.msrb.mxu1 %v1637_v27 }
 0x1c8   : > { %1457 = vmatmul.f32.gmra.mxu3 %v1361_v52  ;;  %1539 = vmatmul.f32.gmra.mxu0 %v1477_v53 }
 0x1c9   : > { %1665 = vmatpush.msrb.mxu1 %v1636_v28 }
 0x1cb   : > { %v1111_v57 = vpop.f32.mrf.mxu2  ;;  %v1410_v58 = vpop.f32.mrf.mxu3 }
 0x1cc   : > { %v1112_v59 = vadd.f32 %v1111_v57, %v1043_v55  ;;  %v1411_v30 = vadd.f32 %v2961_v36, %v1410_v58  ;;  %v1635_v55 = vld [vmem:[#allocation8 + $0x10] sm:$0xff] }
 0x1cd   : > { %1666 = vmatpush.msrb.mxu1 %v1635_v55 }
 0x1ce   : > { %v1362_v60 = vmul.f32 %v1321_v44, %v1112_v59  ;;  %v1478_v62 = vmax.f32 %v1411_v30, 0.0  ;;  %v1634_v30 = vld [vmem:[#allocation8 + $0x8] sm:$0xff] }
 0x1cf   : > { %1667 = vmatpush.msrb.mxu1 %v1634_v30 }
 0x1d0   : > { %1460 = vmatmul.f32.gmra.mxu3 %v1362_v60  ;;  %1542 = vmatmul.f32.gmra.mxu0 %v1478_v62 }
 0x1d1   : > { %1668 = vmatpush.msrb.mxu1 %v1633_v63 }
 0x1d3   : > { %v1114_v2 = vpop.f32.mrf.mxu2  ;;  %v1413_v4 = vpop.f32.mrf.mxu3 }
 0x1d4   : > { %v1115_v5 = vadd.f32 %v1114_v2, %v1046_v1  ;;  %v1414_v34 = vadd.f32 %v2961_v36, %v1413_v4 }
 0x1d6   : > { %v1363_v6 = vmul.f32 %v1326_v56, %v1115_v5  ;;  %v1479_v7 = vmax.f32 %v1414_v34, 0.0 }
 0x1d8   : > { %1463 = vmatmul.f32.gmra.mxu3 %v1363_v6  ;;  %1545 = vmatmul.f32.gmra.mxu0 %v1479_v7 }
 0x1db   : > { %v1116_v13 = vpop.f32.mrf.mxu2  ;;  %v1416_v14 = vpop.f32.mrf.mxu3 }
 0x1dc   : > { %v1117_v38 = vadd.f32 %v1116_v13, %v1048_v12  ;;  %v1417_v3 = vadd.f32 %v2961_v36, %v1416_v14 }
 0x1de   : > { %v1364_v16 = vmul.f32 %v1331_v0, %v1117_v38  ;;  %v1480_v18 = vmax.f32 %v1417_v3, 0.0 }
 0x1e0   : > { %1466 = vmatmul.f32.gmra.mxu3 %v1364_v16  ;;  %1548 = vmatmul.f32.gmra.mxu0 %v1480_v18 }
 0x1e3   : > { %v1119_v10 = vpop.f32.mrf.mxu2  ;;  %v1419_v33 = vpop.f32.mrf.mxu3 }
 0x1e4   : > { %v1120_v24 = vadd.f32 %v1119_v10, %v1051_v21  ;;  %v1420_v43 = vadd.f32 %v2961_v36, %v1419_v33 }
 0x1e6   : > { %v1365_v25 = vmul.f32 %v1336_v17, %v1120_v24  ;;  %v1481_v26 = vmax.f32 %v1420_v43, 0.0 }
 0x1e8   : > { %1469 = vmatmul.f32.gmra.mxu3 %v1365_v25  ;;  %1551 = vmatmul.f32.gmra.mxu0 %v1481_v26 }
 0x1eb   : > { %v1121_v47 = vpop.f32.mrf.mxu2  ;;  %v1422_v32 = vpop.f32.mrf.mxu3 }
 0x1ec   : > { %v1122_v35 = vadd.f32 %v1121_v47, %v1053_v15  ;;  %v1423_v46 = vadd.f32 %v2961_v36, %v1422_v32 }
 0x1ee   : > { %v1366_v19 = vmul.f32 %v1341_v23, %v1122_v35  ;;  %v1482_v61 = vmax.f32 %v1423_v46, 0.0 }
 0x1f0   : > { %1472 = vmatmul.f32.gmra.mxu3 %v1366_v19  ;;  %1554 = vmatmul.f32.gmra.mxu0 %v1482_v61 }
 0x1f3   : > { %v1425_v22 = vpop.f32.mrf.mxu3 }
 0x1f4   : > { %v1426_v11 = vadd.f32 %v2961_v36, %v1425_v22 }
 0x1f6   : > { %v1483_v40 = vmax.f32 %v1426_v11, 0.0 }
 0x1f8   : > { %1557 = vmatmul.f32.gmra.mxu0 %v1483_v40 }
 0x1fb   : > { %v1428_v31 = vpop.f32.mrf.mxu3 }
 0x1fc   : > { %v1429_v41 = vadd.f32 %v2961_v36, %v1428_v31 }
 0x1fe   : > { %v1484_v42 = vmax.f32 %v1429_v41, 0.0 }
 0x200   : > { %1560 = vmatmul.f32.gmra.mxu0 %v1484_v42 }
 0x203   : > { %v1431_v48 = vpop.f32.mrf.mxu3 }
 0x204   : > { %v1432_v49 = vadd.f32 %v2961_v36, %v1431_v48 }
 0x206   : > { %v1485_v51 = vmax.f32 %v1432_v49, 0.0 }
 0x208   : > { %1563 = vmatmul.f32.gmra.mxu0 %v1485_v51 }
 0x20b   : > { %v1434_v52 = vpop.f32.mrf.mxu3 }
 0x20c   : > { %v1435_v53 = vadd.f32 %v2961_v36, %v1434_v52 }
 0x20e   : > { %v1486_v54 = vmax.f32 %v1435_v53, 0.0 }
 0x210   : > { %1566 = vmatmul.f32.gmra.mxu0 %v1486_v54 }
 0x213   : > { %v1437_v57 = vpop.f32.mrf.mxu3 }
 0x214   : > { %v1438_v58 = vadd.f32 %v2961_v36, %v1437_v57 }
 0x216   : > { %v1487_v59 = vmax.f32 %v1438_v58, 0.0 }
 0x218   : > { %1569 = vmatmul.f32.gmra.mxu0 %v1487_v59 }
 0x21b   : > { %v1440_v44 = vpop.f32.mrf.mxu3 }
 0x21c   : > { %v1441_v60 = vadd.f32 %v2961_v36, %v1440_v44 }
 0x21e   : > { %v1488_v62 = vmax.f32 %v1441_v60, 0.0 }
 0x220   : > { %1572 = vmatmul.f32.gmra.mxu0 %v1488_v62 }
 0x223   : > { %v1443_v1 = vpop.f32.mrf.mxu3 }
 0x224   : > { %v1444_v2 = vadd.f32 %v2961_v36, %v1443_v1 }
 0x226   : > { %v1489_v4 = vmax.f32 %v1444_v2, 0.0 }
 0x228   : > { %1575 = vmatmul.f32.gmra.mxu0 %v1489_v4 }
 0x22b   : > { %v1446_v5 = vpop.f32.mrf.mxu3 }
 0x22c   : > { %v1447_v34 = vadd.f32 %v2961_v36, %v1446_v5 }
 0x22e   : > { %v1490_v56 = vmax.f32 %v1447_v34, 0.0 }
 0x230   : > { %1578 = vmatmul.f32.gmra.mxu0 %v1490_v56 }
 0x233   : > { %v1449_v6 = vpop.f32.mrf.mxu3 }
 0x234   : > { %v1450_v7 = vadd.f32 %v2961_v36, %v1449_v6 }
 0x236   : > { %v1491_v8 = vmax.f32 %v1450_v7, 0.0 }
 0x238   : > { %1581 = vmatmul.f32.gmra.mxu0 %v1491_v8 }
 0x23b   : > { %v1452_v12 = vpop.f32.mrf.mxu3 }
 0x23c   : > { %v1453_v13 = vadd.f32 %v2961_v36, %v1452_v12 }
 0x23d   : > { %v1537_v14 = vpop.f32.mrf.mxu0 }
 0x23e   : > { %v1492_v38 = vmax.f32 %v1453_v13, 0.0  ;;  %v1538_v3 = vadd.f32 %v2996_v9, %v1537_v14 }
 0x240   : > { %v1609_v0 = vmax.f32 %v1538_v3, 0.0  ;;  %1584 = vmatmul.f32.gmra.mxu0 %v1492_v38 }
 0x242   : > { %1669 = vmatmul.f32.vlgmr.msrb.gmra.mxu1 %v1609_v0 }
 0x243   : > { %v1455_v16 = vpop.f32.mrf.mxu3 }
 0x244   : > { %v1456_v18 = vadd.f32 %v2961_v36, %v1455_v16 }
 0x245   : > { %v1540_v20 = vpop.f32.mrf.mxu0 }
 0x246   : > { %v1493_v21 = vmax.f32 %v1456_v18, 0.0  ;;  %v1541_v10 = vadd.f32 %v2996_v9, %v1540_v20 }
 0x248   : > { %v1610_v33 = vmax.f32 %v1541_v10, 0.0  ;;  %1587 = vmatmul.f32.gmra.mxu0 %v1493_v21  ;;  %v3026_v21 = vld [vmem:[%s3133_s8] ss:$0 sm:$0xff] }
 0x24a   : > { %1672 = vmatmul.f32.gmra.mxu1 %v1610_v33 }
 0x24b   : > { %v1458_v24 = vpop.f32.mrf.mxu3 }
 0x24c   : > { %v1459_v43 = vadd.f32 %v2961_v36, %v1458_v24 }
 0x24d   : > { %v1543_v17 = vpop.f32.mrf.mxu0 }
 0x24e   : > { %v1494_v25 = vmax.f32 %v1459_v43, 0.0  ;;  %v1544_v26 = vadd.f32 %v2996_v9, %v1543_v17 }
 0x250   : > { %v1611_v29 = vmax.f32 %v1544_v26, 0.0  ;;  %1590 = vmatmul.f32.gmra.mxu0 %v1494_v25 }
 0x252   : > { %1675 = vmatmul.f32.gmra.mxu1 %v1611_v29 }
 0x253   : > { %v1461_v15 = vpop.f32.mrf.mxu3 }
 0x254   : > { %v1462_v47 = vadd.f32 %v2961_v36, %v1461_v15 }
 0x255   : > { %v1546_v32 = vpop.f32.mrf.mxu0 }
 0x256   : > { %v1495_v35 = vmax.f32 %v1462_v47, 0.0  ;;  %v1547_v46 = vadd.f32 %v2996_v9, %v1546_v32 }
 0x258   : > { %v1612_v23 = vmax.f32 %v1547_v46, 0.0  ;;  %1593 = vmatmul.f32.gmra.mxu0 %v1495_v35 }
 0x25a   : > { %1678 = vmatmul.f32.gmra.mxu1 %v1612_v23 }
 0x25b   : > { %v1464_v19 = vpop.f32.mrf.mxu3 }
 0x25c   : > { %v1465_v61 = vadd.f32 %v2961_v36, %v1464_v19 }
 0x25d   : > { %v1549_v37 = vpop.f32.mrf.mxu0 }
 0x25e   : > { %v1496_v39 = vmax.f32 %v1465_v61, 0.0  ;;  %v1550_v22 = vadd.f32 %v2996_v9, %v1549_v37 }
 0x260   : > { %v1613_v11 = vmax.f32 %v1550_v22, 0.0  ;;  %1596 = vmatmul.f32.gmra.mxu0 %v1496_v39 }
 0x262   : > { %1681 = vmatmul.f32.gmra.mxu1 %v1613_v11 }
 0x263   : > { %v1467_v40 = vpop.f32.mrf.mxu3 }
 0x264   : > { %v1468_v50 = vadd.f32 %v2961_v36, %v1467_v40 }
 0x265   : > { %v1552_v31 = vpop.f32.mrf.mxu0 }
 0x266   : > { %v1497_v41 = vmax.f32 %v1468_v50, 0.0  ;;  %v1553_v42 = vadd.f32 %v2996_v9, %v1552_v31 }
 0x268   : > { %v1614_v45 = vmax.f32 %v1553_v42, 0.0  ;;  %1599 = vmatmul.f32.gmra.mxu0 %v1497_v41 }
 0x26a   : > { %1684 = vmatmul.f32.gmra.mxu1 %v1614_v45 }
 0x26b   : > { %v1470_v48 = vpop.f32.mrf.mxu3 }
 0x26c   : > { %v1471_v49 = vadd.f32 %v2961_v36, %v1470_v48 }
 0x26d   : > { %v1555_v51 = vpop.f32.mrf.mxu0 }
 0x26e   : > { %v1498_v27 = vmax.f32 %v1471_v49, 0.0  ;;  %v1556_v28 = vadd.f32 %v2996_v9, %v1555_v51 }
 0x270   : > { %v1615_v52 = vmax.f32 %v1556_v28, 0.0  ;;  %1602 = vmatmul.f32.gmra.mxu0 %v1498_v27 }
 0x272   : > { %1687 = vmatmul.f32.gmra.mxu1 %v1615_v52 }
 0x273   : > { %v1473_v53 = vpop.f32.mrf.mxu3 }
 0x274   : > { %v1474_v54 = vadd.f32 %v2961_v36, %v1473_v53 }
 0x275   : > { %v1558_v55 = vpop.f32.mrf.mxu0 }
 0x276   : > { %v1499_v57 = vmax.f32 %v1474_v54, 0.0  ;;  %v1559_v58 = vadd.f32 %v2996_v9, %v1558_v55 }
 0x278   : > { %v1616_v59 = vmax.f32 %v1559_v58, 0.0  ;;  %1605 = vmatmul.f32.gmra.mxu0 %v1499_v57 }
 0x27a   : > { %1690 = vmatmul.f32.gmra.mxu1 %v1616_v59 }
 0x27d   : > { %v1561_v30 = vpop.f32.mrf.mxu0 }
 0x27e   : > { %v1562_v44 = vadd.f32 %v2996_v9, %v1561_v30 }
 0x280   : > { %v1617_v60 = vmax.f32 %v1562_v44, 0.0 }
 0x282   : > { %1693 = vmatmul.f32.gmra.mxu1 %v1617_v60 }
 0x285   : > { %v1564_v62 = vpop.f32.mrf.mxu0 }
 0x286   : > { %v1565_v63 = vadd.f32 %v2996_v9, %v1564_v62 }
 0x288   : > { %v1618_v1 = vmax.f32 %v1565_v63, 0.0 }
 0x28a   : > { %1696 = vmatmul.f32.gmra.mxu1 %v1618_v1 }
 0x28d   : > { %v1567_v2 = vpop.f32.mrf.mxu0 }
 0x28e   : > { %v1568_v36 = vadd.f32 %v2996_v9, %v1567_v2 }
 0x290   : > { %v1619_v4 = vmax.f32 %v1568_v36, 0.0 }
 0x292   : > { %1699 = vmatmul.f32.gmra.mxu1 %v1619_v4 }
 0x295   : > { %v1570_v5 = vpop.f32.mrf.mxu0 }
 0x296   : > { %v1571_v34 = vadd.f32 %v2996_v9, %v1570_v5 }
 0x298   : > { %v1620_v56 = vmax.f32 %v1571_v34, 0.0 }
 0x29a   : > { %1702 = vmatmul.f32.gmra.mxu1 %v1620_v56 }
 0x29d   : > { %v1573_v6 = vpop.f32.mrf.mxu0 }
 0x29e   : > { %v1574_v7 = vadd.f32 %v2996_v9, %v1573_v6 }
 0x2a0   : > { %v1621_v8 = vmax.f32 %v1574_v7, 0.0 }
 0x2a2   : > { %1705 = vmatmul.f32.gmra.mxu1 %v1621_v8 }
 0x2a5   : > { %v1576_v12 = vpop.f32.mrf.mxu0 }
 0x2a6   : > { %v1577_v13 = vadd.f32 %v2996_v9, %v1576_v12 }
 0x2a8   : > { %v1622_v14 = vmax.f32 %v1577_v13, 0.0 }
 0x2aa   : > { %1708 = vmatmul.f32.gmra.mxu1 %v1622_v14 }
 0x2ad   : > { %v1579_v38 = vpop.f32.mrf.mxu0 }
 0x2ae   : > { %v1580_v3 = vadd.f32 %v2996_v9, %v1579_v38 }
 0x2b0   : > { %v1623_v0 = vmax.f32 %v1580_v3, 0.0 }
 0x2b2   : > { %1711 = vmatmul.f32.gmra.mxu1 %v1623_v0 }
 0x2b5   : > { %v1582_v16 = vpop.f32.mrf.mxu0 }
 0x2b6   : > { %v1583_v18 = vadd.f32 %v2996_v9, %v1582_v16 }
 0x2b8   : > { %v1624_v20 = vmax.f32 %v1583_v18, 0.0 }
 0x2ba   : > { %1714 = vmatmul.f32.gmra.mxu1 %v1624_v20 }
 0x2bd   : > { %v1585_v10 = vpop.f32.mrf.mxu0 }
 0x2be   : > { %v1586_v33 = vadd.f32 %v2996_v9, %v1585_v10 }
 0x2bf   : > { %v1670_v24 = vpop.f32.mrf.mxu1 }
 0x2c0   : > { %v1625_v43 = vmax.f32 %v1586_v33, 0.0  ;;  %v1671_v17 = vadd.f32 %v3026_v21, %v1670_v24 }
 0x2c2   : > { %1742 = vst [vmem:[%s3030_s30] sm:$0xff] %v1671_v17  ;;  %1717 = vmatmul.f32.gmra.mxu1 %v1625_v43 }
 0x2c5   : > { %v1588_v25 = vpop.f32.mrf.mxu0 }
 0x2c6   : > { %v1589_v26 = vadd.f32 %v2996_v9, %v1588_v25 }
 0x2c7   : > { %v1673_v29 = vpop.f32.mrf.mxu1 }
 0x2c8   : > { %v1626_v15 = vmax.f32 %v1589_v26, 0.0  ;;  %v1674_v47 = vadd.f32 %v3026_v21, %v1673_v29 }
 0x2ca   : > { %1743 = vst [vmem:[%s3030_s30 + $0x8] sm:$0xff] %v1674_v47  ;;  %1720 = vmatmul.f32.gmra.mxu1 %v1626_v15 }
 0x2cd   : > { %v1591_v32 = vpop.f32.mrf.mxu0 }
 0x2ce   : > { %v1592_v35 = vadd.f32 %v2996_v9, %v1591_v32 }
 0x2cf   : > { %v1676_v46 = vpop.f32.mrf.mxu1 }
 0x2d0   : > { %v1627_v23 = vmax.f32 %v1592_v35, 0.0  ;;  %v1677_v19 = vadd.f32 %v3026_v21, %v1676_v46 }
 0x2d2   : > { %1744 = vst [vmem:[%s3030_s30 + $0x10] sm:$0xff] %v1677_v19  ;;  %1723 = vmatmul.f32.gmra.mxu1 %v1627_v23 }
 0x2d5   : > { %v1594_v61 = vpop.f32.mrf.mxu0 }
 0x2d6   : > { %v1595_v37 = vadd.f32 %v2996_v9, %v1594_v61 }
 0x2d7   : > { %v1679_v39 = vpop.f32.mrf.mxu1 }
 0x2d8   : > { %v1628_v22 = vmax.f32 %v1595_v37, 0.0  ;;  %v1680_v11 = vadd.f32 %v3026_v21, %v1679_v39 }
 0x2da   : > { %1745 = vst [vmem:[%s3030_s30 + $0x18] sm:$0xff] %v1680_v11  ;;  %1726 = vmatmul.f32.gmra.mxu1 %v1628_v22 }
 0x2dd   : > { %v1597_v40 = vpop.f32.mrf.mxu0 }
 0x2de   : > { %v1598_v50 = vadd.f32 %v2996_v9, %v1597_v40 }
 0x2df   : > { %v1682_v31 = vpop.f32.mrf.mxu1 }
 0x2e0   : > { %v1629_v41 = vmax.f32 %v1598_v50, 0.0  ;;  %v1683_v42 = vadd.f32 %v3026_v21, %v1682_v31 }
 0x2e2   : > { %1746 = vst [vmem:[%s3030_s30 + $0x20] sm:$0xff] %v1683_v42  ;;  %1729 = vmatmul.f32.gmra.mxu1 %v1629_v41 }
 0x2e5   : > { %v1600_v45 = vpop.f32.mrf.mxu0 }
 0x2e6   : > { %v1601_v48 = vadd.f32 %v2996_v9, %v1600_v45 }
 0x2e7   : > { %v1685_v49 = vpop.f32.mrf.mxu1 }
 0x2e8   : > { %v1630_v51 = vmax.f32 %v1601_v48, 0.0  ;;  %v1686_v27 = vadd.f32 %v3026_v21, %v1685_v49 }
 0x2ea   : > { %1747 = vst [vmem:[%s3030_s30 + $0x28] sm:$0xff] %v1686_v27  ;;  %1732 = vmatmul.f32.gmra.mxu1 %v1630_v51 }
 0x2ed   : > { %v1603_v28 = vpop.f32.mrf.mxu0 }
 0x2ee   : > { %v1604_v52 = vadd.f32 %v2996_v9, %v1603_v28 }
 0x2ef   : > { %v1688_v53 = vpop.f32.mrf.mxu1 }
 0x2f0   : > { %v1631_v54 = vmax.f32 %v1604_v52, 0.0  ;;  %v1689_v55 = vadd.f32 %v3026_v21, %v1688_v53 }
 0x2f2   : > { %1748 = vst [vmem:[%s3030_s30 + $0x30] sm:$0xff] %v1689_v55  ;;  %1735 = vmatmul.f32.gmra.mxu1 %v1631_v54 }
 0x2f5   : > { %v1606_v57 = vpop.f32.mrf.mxu0 }
 0x2f6   : > { %v1607_v58 = vadd.f32 %v2996_v9, %v1606_v57 }
 0x2f7   : > { %v1691_v59 = vpop.f32.mrf.mxu1 }
 0x2f8   : > { %v1632_v30 = vmax.f32 %v1607_v58, 0.0  ;;  %v1692_v44 = vadd.f32 %v3026_v21, %v1691_v59 }
 0x2fa   : > { %1749 = vst [vmem:[%s3030_s30 + $0x38] sm:$0xff] %v1692_v44  ;;  %1738 = vmatmul.f32.gmra.mxu1 %v1632_v30 }
 0x2ff   : > { %v1694_v60 = vpop.f32.mrf.mxu1 }
 0x300   : > { %v1695_v62 = vadd.f32 %v3026_v21, %v1694_v60 }
 0x302   : > { %1750 = vst [vmem:[%s3030_s30 + $0x40] sm:$0xff] %v1695_v62 }
 0x307   : > { %v1697_v63 = vpop.f32.mrf.mxu1 }
 0x308   : > { %v1698_v1 = vadd.f32 %v3026_v21, %v1697_v63 }
 0x30a   : > { %1751 = vst [vmem:[%s3030_s30 + $0x48] sm:$0xff] %v1698_v1 }
 0x30f   : > { %v1700_v2 = vpop.f32.mrf.mxu1 }
 0x310   : > { %v1701_v9 = vadd.f32 %v3026_v21, %v1700_v2 }
 0x312   : > { %1752 = vst [vmem:[%s3030_s30 + $0x50] sm:$0xff] %v1701_v9 }
 0x317   : > { %v1703_v36 = vpop.f32.mrf.mxu1 }
 0x318   : > { %v1704_v4 = vadd.f32 %v3026_v21, %v1703_v36 }
 0x31a   : > { %1753 = vst [vmem:[%s3030_s30 + $0x58] sm:$0xff] %v1704_v4 }
 0x31f   : > { %v1706_v5 = vpop.f32.mrf.mxu1 }
 0x320   : > { %v1707_v34 = vadd.f32 %v3026_v21, %v1706_v5 }
 0x322   : > { %1754 = vst [vmem:[%s3030_s30 + $0x60] sm:$0xff] %v1707_v34 }
 0x327   : > { %v1709_v56 = vpop.f32.mrf.mxu1 }
 0x328   : > { %v1710_v6 = vadd.f32 %v3026_v21, %v1709_v56 }
 0x32a   : > { %1755 = vst [vmem:[%s3030_s30 + $0x68] sm:$0xff] %v1710_v6 }
 0x32f   : > { %v1712_v7 = vpop.f32.mrf.mxu1 }
 0x330   : > { %v1713_v8 = vadd.f32 %v3026_v21, %v1712_v7 }
 0x332   : > { %1756 = vst [vmem:[%s3030_s30 + $0x70] sm:$0xff] %v1713_v8 }
 0x337   : > { %v1715_v12 = vpop.f32.mrf.mxu1 }
 0x338   : > { %v1716_v13 = vadd.f32 %v3026_v21, %v1715_v12 }
 0x33a   : > { %1757 = vst [vmem:[%s3030_s30 + $0x78] sm:$0xff] %v1716_v13 }
 0x33f   : > { %v1718_v14 = vpop.f32.mrf.mxu1 }
 0x340   : > { %v1719_v38 = vadd.f32 %v3026_v21, %v1718_v14 }
 0x342   : > { %1758 = vst [vmem:[%s3030_s30 + $0x80] sm:$0xff] %v1719_v38 }
 0x347   : > { %v1721_v3 = vpop.f32.mrf.mxu1 }
 0x348   : > { %v1722_v0 = vadd.f32 %v3026_v21, %v1721_v3 }
 0x34a   : > { %1759 = vst [vmem:[%s3030_s30 + $0x88] sm:$0xff] %v1722_v0 }
 0x34f   : > { %v1724_v16 = vpop.f32.mrf.mxu1 }
 0x350   : > { %v1725_v18 = vadd.f32 %v3026_v21, %v1724_v16 }
 0x352   : > { %1760 = vst [vmem:[%s3030_s30 + $0x90] sm:$0xff] %v1725_v18 }
 0x357   : > { %v1727_v20 = vpop.f32.mrf.mxu1 }
 0x358   : > { %v1728_v10 = vadd.f32 %v3026_v21, %v1727_v20 }
 0x35a   : > { %1761 = vst [vmem:[%s3030_s30 + $0x98] sm:$0xff] %v1728_v10 }
 0x35f   : > { %v1730_v33 = vpop.f32.mrf.mxu1 }
 0x360   : > { %v1731_v24 = vadd.f32 %v3026_v21, %v1730_v33 }
 0x362   : > { %1762 = vst [vmem:[%s3030_s30 + $0xa0] sm:$0xff] %v1731_v24 }
 0x367   : > { %v1733_v43 = vpop.f32.mrf.mxu1 }
 0x368   : > { %v1734_v17 = vadd.f32 %v3026_v21, %v1733_v43 }
 0x36a   : > { %1763 = vst [vmem:[%s3030_s30 + $0xa8] sm:$0xff] %v1734_v17 }
 0x36f   : > { %v1736_v25 = vpop.f32.mrf.mxu1 }
 0x370   : > { %v1737_v26 = vadd.f32 %v3026_v21, %v1736_v25 }
 0x372   : > { %1764 = vst [vmem:[%s3030_s30 + $0xb0] sm:$0xff] %v1737_v26 }
 0x377   : > { %v1739_v29 = vpop.f32.mrf.mxu1 }
 0x378   : > { %v1740_v15 = vadd.f32 %v3026_v21, %v1739_v29 }
 0x37a   : > { %1765 = vst [vmem:[%s3030_s30 + $0xb8] sm:$0xff] %v1740_v15 }
 0x37b   : > { %2448 = shalt.err (!%p2445_p3)
}
 0x37c   : > { %s2516_s5 = smov 128   ;;  %s2517_s9 = smov 8  }
 0x37d   : > { %2244 = dma.vmem_to_hbm [thread:$0]  (%p2647_p7), %s1780_s28, 3072, %s1782_s17, %s1767_s15, %s2516_s5, %s2516_s5, %s2517_s9  }
 0x37e PF: > { %s3155_s30 = sld [smem:[#allocation13_spill]]  ;;  %p2258_p5 = pnand %p1904_p11, %p2617_p6 }
 0x37f   : > { %s3157_s20 = sld [smem:[#allocation14_spill]] }
 0x380   : > { %p2259_p9 = pneg %p2258_p5 }
 0x384   : > { %s1796_s24 = sand.u32 1, %s3155_s30  }
 0x385   : > { %s1797_s26 = scalar_lea.sflag [#allocation5], %s1796_s24 }
 0x386   : > { %2482 = dma.done.wait (%p2259_p9), %s1797_s26, 3072  }
 0x387   : > { %2484 = vsyncadd (%p2259_p9), %s1797_s26, 4294964224  ;;  %s26_s14 = sadd.s32 1, %s3157_s20   ;;  %s3158_s30 = smov %s2491_s10 }
 0x388   : > { %p23_p10 = scmp.ge.s32.totalorder %s26_s14, 4   ;;  %s3159_s10 = smov %s2495_s11 }
 0x389   : > { %s3160_s11 = smov %s2655_s29  ;;  %s3161_s12 = smov %s2503_s13 }
 0x38a   : > { %s3162_s13 = smov %s3164_s25  ;;  %25 = sbr.rel (!%p23_p10) target bundleno = 11 (0xb), region = 121 }
 0x38f   :  { %1803 = vsyncpa [#allocation4], 1 }
 0x390   :  { %1805 = vsyncpa [#allocation4 + $0x1], 1 }
 0x391   :  { %1806 = vsyncpa [#allocation7], 1 }
 0x392   :  { %1807 = vsyncpa [#allocation5], 1 }
 0x393   :  { %1809 = vsyncpa [#allocation5 + $0x1], 1 }

</bundles_post_ra>
